<compile_context>
chip_gen: v7x
topology: tpu7x:2x2x1
jax: 0.10.0
libtpu: 0.0.40
codegen_flags: <defaults>
</compile_context>

<pallas_src>
import jax
import jax.numpy as jnp
from jax.experimental import pallas as pl
from jax.experimental.pallas import tpu as pltpu


def _lstm_mlp_kernel(x_ref, c_ref, lstm_ref, mlp_ref, out_ref):
    f32 = jnp.float32
    S, input_dim = x_ref.shape
    cond = c_ref.shape[1]
    G = lstm_ref.shape[1] // 2          # 4*H
    H = G // 4
    L = mlp_ref.shape[1]                # 128-lane MLP slab width

    # ---------------- unpack slabs (static, tile-aligned slices) --------------
    w_fused = lstm_ref[0:H, :]                                  # (H, 2G) = [whh0 | wih1]
    whh1 = lstm_ref[H:2 * H, 0:G]                               # (H, G)
    wih0 = lstm_ref[2 * H:2 * H + input_dim, 0:G]               # (input_dim, G)
    lb = lstm_ref[2 * H + input_dim:2 * H + input_dim + 8, :]   # bias tile
    b1 = lb[0:1, G:2 * G]                                       # layer-1 bias (scaled)

    r0 = 0
    w1h = mlp_ref[r0:r0 + H, :]; r0 += H                        # (H, L)
    w1c = mlp_ref[r0:r0 + cond, :]; r0 += cond                  # (cond, L)
    w2_off = r0; r0 += L
    w3_off = r0; r0 += L
    w4_off = r0; r0 += L
    mb = mlp_ref[r0:r0 + 8, :]                                  # MLP bias tile
    bf1, bf2, bf3, bf4 = mb[0:1, :], mb[1:2, :], mb[2:3, :], mb[3:4, :]

    # ------------- recurrence-independent work (scheduler filler) -------------
    # Layer-0 input-gate preactivations for every step (+ layer-0 bias).
    xw0 = jnp.dot(x_ref[...], wih0, preferred_element_type=f32) + lb[0:1, 0:G]
    # Conditional branch of fc1 (independent of the LSTM).
    y_c = jnp.dot(c_ref[...], w1c, preferred_element_type=f32) + bf1

    def cell(gates, c_prev):
        # i/f/o columns are pre-scaled by 0.5 on the host, so one tanh gives
        # sigmoid via 0.5 + 0.5*tanh(x/2) and the raw tanh for the g gate.
        t = jnp.tanh(gates)
        i_g = 0.5 + 0.5 * t[:, 0:H]
        f_g = 0.5 + 0.5 * t[:, H:2 * H]
        g_g = t[:, 2 * H:3 * H]
        o_g = 0.5 + 0.5 * t[:, 3 * H:4 * H]
        c_new = f_g * c_prev + i_g * g_g
        h_new = o_g * jnp.tanh(c_new)
        return h_new, c_new

    zeros_h = jnp.zeros((1, H), f32)
    c0, h1, c1 = zeros_h, zeros_h, zeros_h
    rec0 = jnp.zeros((1, G), f32)       # h0_{-1} @ whh0 == 0
    y_rows = []

    # --------- wavefront-fused, fully unrolled time loop (no VMEM I/O) --------
    for t in range(S):
        # layer 0, step t
        h0, c0 = cell(xw0[t:t + 1, :] + rec0, c0)
        # single fused MXU push off h0_t: [h0 @ whh0 | h0 @ wih1]
        fused = jnp.dot(h0, w_fused, preferred_element_type=f32)   # (1, 2G)
        rec0 = fused[:, 0:G]
        # layer 1, step t; the whh1 dot only needs h1_{t-1} (off the h0 chain)
        g1 = fused[:, G:2 * G] + jnp.dot(h1, whh1, preferred_element_type=f32) + b1
        h1, c1 = cell(g1, c1)
        # fc1 row for this step — MXU filler under the recurrence
        y_rows.append(jnp.dot(h1, w1h, preferred_element_type=f32) + y_c[t:t + 1, :])

    # ----------------------- MLP tail (lane-dense, padded) --------------------
    y = jnp.maximum(jnp.concatenate(y_rows, axis=0), 0.0)          # (S, L)
    y = jnp.maximum(
        jnp.dot(y, mlp_ref[w2_off:w2_off + L, :], preferred_element_type=f32) + bf2, 0.0)
    y = jnp.maximum(
        jnp.dot(y, mlp_ref[w3_off:w3_off + L, :], preferred_element_type=f32) + bf3, 0.0)
    y = jnp.dot(y, mlp_ref[w4_off:w4_off + L, :], preferred_element_type=f32) + bf4
    out_ref[...] = y[:, 0:1]


def pack_params(params, input_dim, cond_dim, H):
    """Pack all weights into two lane-dense f32 slabs (one DMA each).

    LSTM slab (2H+input_dim+8 rows, 8H lanes); i/f/o gate columns pre-scaled
    by 0.5 so one in-kernel tanh yields both sigmoid and tanh(g):
      rows [0, H)             : [whh0 | wih1]   (fused h0 RHS)
      rows [H, 2H)            : [whh1 | 0]
      rows [2H, 2H+input_dim) : [wih0 | 0]
      row  2H+input_dim       : [b0   | b1]     (b_ih+b_hh, scaled)
    MLP slab (H+cond+3*128+8 rows, 128 lanes), zero-padded to 128 lanes:
      w1h, w1c, w2(128x128 pad), w3(128x128 pad), w4(128x128 pad), bias rows.
    """
    assert H % 8 == 0 and input_dim % 8 == 0 and cond_dim % 8 == 0
    G = 4 * H
    L = 128
    gate_scale = jnp.concatenate([
        jnp.full((H,), 0.5, jnp.float32),
        jnp.full((H,), 0.5, jnp.float32),
        jnp.ones((H,), jnp.float32),
        jnp.full((H,), 0.5, jnp.float32)])
    gs = lambda w: (w * gate_scale[None, :]).astype(jnp.float32)

    lstm = jnp.zeros((2 * H + input_dim + 8, 2 * G), jnp.float32)
    lstm = lstm.at[0:H, 0:G].set(gs(params["whh0"]))
    lstm = lstm.at[0:H, G:2 * G].set(gs(params["wih1"]))
    lstm = lstm.at[H:2 * H, 0:G].set(gs(params["whh1"]))
    lstm = lstm.at[2 * H:2 * H + input_dim, 0:G].set(gs(params["wih0"]))
    lstm = lstm.at[2 * H + input_dim, 0:G].set(gs(params["b0"])[0])
    lstm = lstm.at[2 * H + input_dim, G:2 * G].set(gs(params["b1"])[0])

    d1 = params["w1h"].shape[1]   # 64
    d2 = params["w2"].shape[1]    # 32
    d3 = params["w3"].shape[1]    # 16
    d4 = params["w4"].shape[1]    # 1
    assert max(d1, d2, d3, d4) <= L

    mlp = jnp.zeros((H + cond_dim + 3 * L + 8, L), jnp.float32)
    r = 0
    mlp = mlp.at[r:r + H, 0:d1].set(params["w1h"]); r += H
    mlp = mlp.at[r:r + cond_dim, 0:d1].set(params["w1c"]); r += cond_dim
    mlp = mlp.at[r:r + d1, 0:d2].set(params["w2"]); r += L
    mlp = mlp.at[r:r + d2, 0:d3].set(params["w3"]); r += L
    mlp = mlp.at[r:r + d3, 0:d4].set(params["w4"]); r += L
    mlp = mlp.at[r + 0, 0:d1].set(params["bf1"][0])
    mlp = mlp.at[r + 1, 0:d2].set(params["bf2"][0])
    mlp = mlp.at[r + 2, 0:d3].set(params["bf3"][0])
    mlp = mlp.at[r + 3, 0:d4].set(params["bf4"][0])
    return lstm, mlp


def lstm_mlp_forward(x, c, lstm_slab, mlp_slab):
    S = x.shape[0]
    args = (x, c, lstm_slab, mlp_slab)
    return pl.pallas_call(
        _lstm_mlp_kernel,
        out_shape=jax.ShapeDtypeStruct((S, 1), jnp.float32),
        in_specs=[pl.BlockSpec(memory_space=pltpu.MemorySpace.VMEM)] * len(args),
        out_specs=pl.BlockSpec(memory_space=pltpu.MemorySpace.VMEM),
    )(*args)


# ---------------------------- reference (pure JAX) ----------------------------
def reference_forward(x, c, params):
    H = params["whh0"].shape[0]

    def lstm_layer(inp, wih, whh, b):
        h = jnp.zeros((H,), jnp.float32)
        cs = jnp.zeros((H,), jnp.float32)
        outs = []
        for t in range(inp.shape[0]):
            gates = inp[t] @ wih + h @ whh + b[0]
            i_g = jax.nn.sigmoid(gates[0:H])
            f_g = jax.nn.sigmoid(gates[H:2 * H])
            g_g = jnp.tanh(gates[2 * H:3 * H])
            o_g = jax.nn.sigmoid(gates[3 * H:4 * H])
            cs = f_g * cs + i_g * g_g
            h = o_g * jnp.tanh(cs)
            outs.append(h)
        return jnp.stack(outs)

    out = lstm_layer(x, params["wih0"], params["whh0"], params["b0"])
    out = lstm_layer(out, params["wih1"], params["whh1"], params["b1"])
    y = jnp.concatenate([out, c], axis=1)
    y = jnp.maximum(y @ jnp.concatenate([params["w1h"], params["w1c"]], axis=0)
                    + params["bf1"][0], 0.0)
    y = jnp.maximum(y @ params["w2"] + params["bf2"][0], 0.0)
    y = jnp.maximum(y @ params["w3"] + params["bf3"][0], 0.0)
    y = y @ params["w4"] + params["bf4"][0]
    return y


# ------------------------------------ main ------------------------------------
if __name__ == "__main__":
    # Module hyper-params (small, consistent with the forward pass).
    input_dim, conditional_dim, hidden_dim, seq_len = 16, 8, 32, 8
    H = hidden_dim
    k = 1.0 / jnp.sqrt(jnp.float32(H))

    key = jax.random.PRNGKey(0)
    keys = jax.random.split(key, 20)
    u = lambda kk, shape, lim: jax.random.uniform(
        kk, shape, jnp.float32, minval=-lim, maxval=lim)

    params = {
        # LSTM layer 0 (weights stored as (in, 4H); biases pre-summed b_ih + b_hh)
        "wih0": u(keys[0], (input_dim, 4 * H), k),
        "whh0": u(keys[1], (H, 4 * H), k),
        "b0":   u(keys[2], (1, 4 * H), k) + u(keys[3], (1, 4 * H), k),
        # LSTM layer 1
        "wih1": u(keys[4], (H, 4 * H), k),
        "whh1": u(keys[5], (H, 4 * H), k),
        "b1":   u(keys[6], (1, 4 * H), k) + u(keys[7], (1, 4 * H), k),
        # fc1: (H + conditional_dim) -> 64, split into hidden / conditional parts
        "w1h": u(keys[8], (H, 64), 0.1),
        "w1c": u(keys[9], (conditional_dim, 64), 0.1),
        "bf1": u(keys[10], (1, 64), 0.1),
        # fc2: 64 -> 32
        "w2": u(keys[11], (64, 32), 0.1),
        "bf2": u(keys[12], (1, 32), 0.1),
        # fc3: 32 -> 16
        "w3": u(keys[13], (32, 16), 0.1),
        "bf3": u(keys[14], (1, 16), 0.1),
        # fc4: 16 -> 1
        "w4": u(keys[15], (16, 1), 0.1),
        "bf4": u(keys[16], (1, 1), 0.1),
    }

    x = jax.random.normal(keys[17], (seq_len, input_dim), jnp.float32)
    c = jax.random.normal(keys[18], (seq_len, conditional_dim), jnp.float32)

    # Host-side, one-time packing into two lane-dense slabs (2 DMAs at run time).
    lstm_slab, mlp_slab = pack_params(params, input_dim, conditional_dim, H)
    lstm_slab, mlp_slab = jax.block_until_ready((lstm_slab, mlp_slab))

    out = jax.block_until_ready(lstm_mlp_forward(x, c, lstm_slab, mlp_slab))
    ref = jax.block_until_ready(reference_forward(x, c, params))

    assert out.shape == (seq_len, 1)
    assert jnp.allclose(out, ref, rtol=1e-2, atol=1e-2), (out, ref)
    print("KERNEL_OK")
</pallas_src>

<mosaic_0001>
module attributes {stable_mosaic.version = 11 : i64} {
  func.func @_lstm_mlp_kernel(%arg0: memref<8x16xf32, #tpu.memory_space<vmem>>, %arg1: memref<8x8xf32, #tpu.memory_space<vmem>>, %arg2: memref<88x256xf32, #tpu.memory_space<vmem>>, %arg3: memref<432x128xf32, #tpu.memory_space<vmem>>, %arg4: memref<8x1xf32, #tpu.memory_space<vmem>>) attributes {dimension_semantics = [], scalar_prefetch = 0 : i64, scratch_operands = 0 : i64, tpu.core_type = #tpu.core_type<tc>} {
    %c0 = arith.constant 0 : index
    %c0_0 = arith.constant 0 : index
    %0 = vector.load %arg2[%c0, %c0_0] : memref<88x256xf32, #tpu.memory_space<vmem>>, vector<32x256xf32>
    %c32 = arith.constant 32 : index
    %c0_1 = arith.constant 0 : index
    %1 = vector.load %arg2[%c32, %c0_1] : memref<88x256xf32, #tpu.memory_space<vmem>>, vector<32x128xf32>
    %c64 = arith.constant 64 : index
    %c0_2 = arith.constant 0 : index
    %2 = vector.load %arg2[%c64, %c0_2] : memref<88x256xf32, #tpu.memory_space<vmem>>, vector<16x128xf32>
    %c80 = arith.constant 80 : index
    %c0_3 = arith.constant 0 : index
    %3 = vector.load %arg2[%c80, %c0_3] : memref<88x256xf32, #tpu.memory_space<vmem>>, vector<8x256xf32>
    %4 = vector.extract_strided_slice %3 {offsets = [0, 128], sizes = [1, 128], strides = [1, 1]} : vector<8x256xf32> to vector<1x128xf32>
    %c0_4 = arith.constant 0 : index
    %c0_5 = arith.constant 0 : index
    %5 = vector.load %arg3[%c0_4, %c0_5] : memref<432x128xf32, #tpu.memory_space<vmem>>, vector<32x128xf32>
    %c32_6 = arith.constant 32 : index
    %c0_7 = arith.constant 0 : index
    %6 = vector.load %arg3[%c32_6, %c0_7] : memref<432x128xf32, #tpu.memory_space<vmem>>, vector<8x128xf32>
    %c424 = arith.constant 424 : index
    %c0_8 = arith.constant 0 : index
    %7 = vector.load %arg3[%c424, %c0_8] : memref<432x128xf32, #tpu.memory_space<vmem>>, vector<8x128xf32>
    %8 = vector.extract_strided_slice %7 {offsets = [0, 0], sizes = [1, 128], strides = [1, 1]} : vector<8x128xf32> to vector<1x128xf32>
    %9 = vector.extract_strided_slice %7 {offsets = [1, 0], sizes = [1, 128], strides = [1, 1]} : vector<8x128xf32> to vector<1x128xf32>
    %10 = vector.extract_strided_slice %7 {offsets = [2, 0], sizes = [1, 128], strides = [1, 1]} : vector<8x128xf32> to vector<1x128xf32>
    %11 = vector.extract_strided_slice %7 {offsets = [3, 0], sizes = [1, 128], strides = [1, 1]} : vector<8x128xf32> to vector<1x128xf32>
    %c0_9 = arith.constant 0 : index
    %c0_10 = arith.constant 0 : index
    %12 = vector.load %arg0[%c0_9, %c0_10] : memref<8x16xf32, #tpu.memory_space<vmem>>, vector<8x16xf32>
    %cst = arith.constant dense<0.000000e+00> : vector<8x128xf32>
    %13 = tpu.matmul %12, %2, %cst {dimension_numbers = #tpu.dot_dimension_numbers<[1], [0], [0], [1], [0, 0, 1, 1], [], []>} : vector<8x16xf32>, vector<16x128xf32>, vector<8x128xf32> -> vector<8x128xf32>
    %14 = vector.extract_strided_slice %3 {offsets = [0, 0], sizes = [1, 128], strides = [1, 1]} : vector<8x256xf32> to vector<1x128xf32>
    %15 = vector.broadcast %14 : vector<1x128xf32> to vector<8x128xf32>
    %16 = arith.addf %13, %15 : vector<8x128xf32>
    %c0_11 = arith.constant 0 : index
    %c0_12 = arith.constant 0 : index
    %17 = vector.load %arg1[%c0_11, %c0_12] : memref<8x8xf32, #tpu.memory_space<vmem>>, vector<8x8xf32>
    %cst_13 = arith.constant dense<0.000000e+00> : vector<8x128xf32>
    %18 = tpu.matmul %17, %6, %cst_13 {dimension_numbers = #tpu.dot_dimension_numbers<[1], [0], [0], [1], [0, 0, 1, 1], [], []>} : vector<8x8xf32>, vector<8x128xf32>, vector<8x128xf32> -> vector<8x128xf32>
    %19 = vector.broadcast %8 : vector<1x128xf32> to vector<8x128xf32>
    %20 = arith.addf %18, %19 : vector<8x128xf32>
    %cst_14 = arith.constant 0.000000e+00 : f32
    %21 = vector.broadcast %cst_14 : f32 to vector<1x32xf32>
    %cst_15 = arith.constant 0.000000e+00 : f32
    %22 = vector.broadcast %cst_15 : f32 to vector<1x128xf32>
    %23 = vector.extract_strided_slice %16 {offsets = [0, 0], sizes = [1, 128], strides = [1, 1]} : vector<8x128xf32> to vector<1x128xf32>
    %24 = arith.addf %23, %22 : vector<1x128xf32>
    %25 = math.tanh %24 : vector<1x128xf32>
    %26 = vector.extract_strided_slice %25 {offsets = [0, 0], sizes = [1, 32], strides = [1, 1]} : vector<1x128xf32> to vector<1x32xf32>
    %cst_16 = arith.constant 5.000000e-01 : f32
    %27 = vector.broadcast %cst_16 : f32 to vector<1x32xf32>
    %28 = arith.mulf %27, %26 : vector<1x32xf32>
    %cst_17 = arith.constant 5.000000e-01 : f32
    %29 = vector.broadcast %cst_17 : f32 to vector<1x32xf32>
    %30 = arith.addf %29, %28 : vector<1x32xf32>
    %31 = vector.extract_strided_slice %25 {offsets = [0, 32], sizes = [1, 32], strides = [1, 1]} : vector<1x128xf32> to vector<1x32xf32>
    %cst_18 = arith.constant 5.000000e-01 : f32
    %32 = vector.broadcast %cst_18 : f32 to vector<1x32xf32>
    %33 = arith.mulf %32, %31 : vector<1x32xf32>
    %cst_19 = arith.constant 5.000000e-01 : f32
    %34 = vector.broadcast %cst_19 : f32 to vector<1x32xf32>
    %35 = arith.addf %34, %33 : vector<1x32xf32>
    %36 = vector.extract_strided_slice %25 {offsets = [0, 64], sizes = [1, 32], strides = [1, 1]} : vector<1x128xf32> to vector<1x32xf32>
    %37 = vector.extract_strided_slice %25 {offsets = [0, 96], sizes = [1, 32], strides = [1, 1]} : vector<1x128xf32> to vector<1x32xf32>
    %cst_20 = arith.constant 5.000000e-01 : f32
    %38 = vector.broadcast %cst_20 : f32 to vector<1x32xf32>
    %39 = arith.mulf %38, %37 : vector<1x32xf32>
    %cst_21 = arith.constant 5.000000e-01 : f32
    %40 = vector.broadcast %cst_21 : f32 to vector<1x32xf32>
    %41 = arith.addf %40, %39 : vector<1x32xf32>
    %42 = arith.mulf %35, %21 : vector<1x32xf32>
    %43 = arith.mulf %30, %36 : vector<1x32xf32>
    %44 = arith.addf %42, %43 : vector<1x32xf32>
    %45 = math.tanh %44 : vector<1x32xf32>
    %46 = arith.mulf %41, %45 : vector<1x32xf32>
    %cst_22 = arith.constant dense<0.000000e+00> : vector<1x256xf32>
    %47 = tpu.matmul %46, %0, %cst_22 {dimension_numbers = #tpu.dot_dimension_numbers<[1], [0], [0], [1], [0, 0, 1, 1], [], []>} : vector<1x32xf32>, vector<32x256xf32>, vector<1x256xf32> -> vector<1x256xf32>
    %48 = vector.extract_strided_slice %47 {offsets = [0, 0], sizes = [1, 128], strides = [1, 1]} : vector<1x256xf32> to vector<1x128xf32>
    %49 = vector.extract_strided_slice %47 {offsets = [0, 128], sizes = [1, 128], strides = [1, 1]} : vector<1x256xf32> to vector<1x128xf32>
    %cst_23 = arith.constant dense<0.000000e+00> : vector<1x128xf32>
    %50 = tpu.matmul %21, %1, %cst_23 {dimension_numbers = #tpu.dot_dimension_numbers<[1], [0], [0], [1], [0, 0, 1, 1], [], []>} : vector<1x32xf32>, vector<32x128xf32>, vector<1x128xf32> -> vector<1x128xf32>
    %51 = arith.addf %49, %50 : vector<1x128xf32>
    %52 = arith.addf %51, %4 : vector<1x128xf32>
    %53 = math.tanh %52 : vector<1x128xf32>
    %54 = vector.extract_strided_slice %53 {offsets = [0, 0], sizes = [1, 32], strides = [1, 1]} : vector<1x128xf32> to vector<1x32xf32>
    %cst_24 = arith.constant 5.000000e-01 : f32
    %55 = vector.broadcast %cst_24 : f32 to vector<1x32xf32>
    %56 = arith.mulf %55, %54 : vector<1x32xf32>
    %cst_25 = arith.constant 5.000000e-01 : f32
    %57 = vector.broadcast %cst_25 : f32 to vector<1x32xf32>
    %58 = arith.addf %57, %56 : vector<1x32xf32>
    %59 = vector.extract_strided_slice %53 {offsets = [0, 32], sizes = [1, 32], strides = [1, 1]} : vector<1x128xf32> to vector<1x32xf32>
    %cst_26 = arith.constant 5.000000e-01 : f32
    %60 = vector.broadcast %cst_26 : f32 to vector<1x32xf32>
    %61 = arith.mulf %60, %59 : vector<1x32xf32>
    %cst_27 = arith.constant 5.000000e-01 : f32
    %62 = vector.broadcast %cst_27 : f32 to vector<1x32xf32>
    %63 = arith.addf %62, %61 : vector<1x32xf32>
    %64 = vector.extract_strided_slice %53 {offsets = [0, 64], sizes = [1, 32], strides = [1, 1]} : vector<1x128xf32> to vector<1x32xf32>
    %65 = vector.extract_strided_slice %53 {offsets = [0, 96], sizes = [1, 32], strides = [1, 1]} : vector<1x128xf32> to vector<1x32xf32>
    %cst_28 = arith.constant 5.000000e-01 : f32
    %66 = vector.broadcast %cst_28 : f32 to vector<1x32xf32>
    %67 = arith.mulf %66, %65 : vector<1x32xf32>
    %cst_29 = arith.constant 5.000000e-01 : f32
    %68 = vector.broadcast %cst_29 : f32 to vector<1x32xf32>
    %69 = arith.addf %68, %67 : vector<1x32xf32>
    %70 = arith.mulf %63, %21 : vector<1x32xf32>
    %71 = arith.mulf %58, %64 : vector<1x32xf32>
    %72 = arith.addf %70, %71 : vector<1x32xf32>
    %73 = math.tanh %72 : vector<1x32xf32>
    %74 = arith.mulf %69, %73 : vector<1x32xf32>
    %cst_30 = arith.constant dense<0.000000e+00> : vector<1x128xf32>
    %75 = tpu.matmul %74, %5, %cst_30 {dimension_numbers = #tpu.dot_dimension_numbers<[1], [0], [0], [1], [0, 0, 1, 1], [], []>} : vector<1x32xf32>, vector<32x128xf32>, vector<1x128xf32> -> vector<1x128xf32>
    %76 = vector.extract_strided_slice %20 {offsets = [0, 0], sizes = [1, 128], strides = [1, 1]} : vector<8x128xf32> to vector<1x128xf32>
    %77 = arith.addf %75, %76 : vector<1x128xf32>
    %78 = vector.extract_strided_slice %16 {offsets = [1, 0], sizes = [1, 128], strides = [1, 1]} : vector<8x128xf32> to vector<1x128xf32>
    %79 = arith.addf %78, %48 : vector<1x128xf32>
    %80 = math.tanh %79 : vector<1x128xf32>
    %81 = vector.extract_strided_slice %80 {offsets = [0, 0], sizes = [1, 32], strides = [1, 1]} : vector<1x128xf32> to vector<1x32xf32>
    %cst_31 = arith.constant 5.000000e-01 : f32
    %82 = vector.broadcast %cst_31 : f32 to vector<1x32xf32>
    %83 = arith.mulf %82, %81 : vector<1x32xf32>
    %cst_32 = arith.constant 5.000000e-01 : f32
    %84 = vector.broadcast %cst_32 : f32 to vector<1x32xf32>
    %85 = arith.addf %84, %83 : vector<1x32xf32>
    %86 = vector.extract_strided_slice %80 {offsets = [0, 32], sizes = [1, 32], strides = [1, 1]} : vector<1x128xf32> to vector<1x32xf32>
    %cst_33 = arith.constant 5.000000e-01 : f32
    %87 = vector.broadcast %cst_33 : f32 to vector<1x32xf32>
    %88 = arith.mulf %87, %86 : vector<1x32xf32>
    %cst_34 = arith.constant 5.000000e-01 : f32
    %89 = vector.broadcast %cst_34 : f32 to vector<1x32xf32>
    %90 = arith.addf %89, %88 : vector<1x32xf32>
    %91 = vector.extract_strided_slice %80 {offsets = [0, 64], sizes = [1, 32], strides = [1, 1]} : vector<1x128xf32> to vector<1x32xf32>
    %92 = vector.extract_strided_slice %80 {offsets = [0, 96], sizes = [1, 32], strides = [1, 1]} : vector<1x128xf32> to vector<1x32xf32>
    %cst_35 = arith.constant 5.000000e-01 : f32
    %93 = vector.broadcast %cst_35 : f32 to vector<1x32xf32>
    %94 = arith.mulf %93, %92 : vector<1x32xf32>
    %cst_36 = arith.constant 5.000000e-01 : f32
    %95 = vector.broadcast %cst_36 : f32 to vector<1x32xf32>
    %96 = arith.addf %95, %94 : vector<1x32xf32>
    %97 = arith.mulf %90, %44 : vector<1x32xf32>
    %98 = arith.mulf %85, %91 : vector<1x32xf32>
    %99 = arith.addf %97, %98 : vector<1x32xf32>
    %100 = math.tanh %99 : vector<1x32xf32>
    %101 = arith.mulf %96, %100 : vector<1x32xf32>
    %cst_37 = arith.constant dense<0.000000e+00> : vector<1x256xf32>
    %102 = tpu.matmul %101, %0, %cst_37 {dimension_numbers = #tpu.dot_dimension_numbers<[1], [0], [0], [1], [0, 0, 1, 1], [], []>} : vector<1x32xf32>, vector<32x256xf32>, vector<1x256xf32> -> vector<1x256xf32>
    %103 = vector.extract_strided_slice %102 {offsets = [0, 0], sizes = [1, 128], strides = [1, 1]} : vector<1x256xf32> to vector<1x128xf32>
    %104 = vector.extract_strided_slice %102 {offsets = [0, 128], sizes = [1, 128], strides = [1, 1]} : vector<1x256xf32> to vector<1x128xf32>
    %cst_38 = arith.constant dense<0.000000e+00> : vector<1x128xf32>
    %105 = tpu.matmul %74, %1, %cst_38 {dimension_numbers = #tpu.dot_dimension_numbers<[1], [0], [0], [1], [0, 0, 1, 1], [], []>} : vector<1x32xf32>, vector<32x128xf32>, vector<1x128xf32> -> vector<1x128xf32>
    %106 = arith.addf %104, %105 : vector<1x128xf32>
    %107 = arith.addf %106, %4 : vector<1x128xf32>
    %108 = math.tanh %107 : vector<1x128xf32>
    %109 = vector.extract_strided_slice %108 {offsets = [0, 0], sizes = [1, 32], strides = [1, 1]} : vector<1x128xf32> to vector<1x32xf32>
    %cst_39 = arith.constant 5.000000e-01 : f32
    %110 = vector.broadcast %cst_39 : f32 to vector<1x32xf32>
    %111 = arith.mulf %110, %109 : vector<1x32xf32>
    %cst_40 = arith.constant 5.000000e-01 : f32
    %112 = vector.broadcast %cst_40 : f32 to vector<1x32xf32>
    %113 = arith.addf %112, %111 : vector<1x32xf32>
    %114 = vector.extract_strided_slice %108 {offsets = [0, 32], sizes = [1, 32], strides = [1, 1]} : vector<1x128xf32> to vector<1x32xf32>
    %cst_41 = arith.constant 5.000000e-01 : f32
    %115 = vector.broadcast %cst_41 : f32 to vector<1x32xf32>
    %116 = arith.mulf %115, %114 : vector<1x32xf32>
    %cst_42 = arith.constant 5.000000e-01 : f32
    %117 = vector.broadcast %cst_42 : f32 to vector<1x32xf32>
    %118 = arith.addf %117, %116 : vector<1x32xf32>
    %119 = vector.extract_strided_slice %108 {offsets = [0, 64], sizes = [1, 32], strides = [1, 1]} : vector<1x128xf32> to vector<1x32xf32>
    %120 = vector.extract_strided_slice %108 {offsets = [0, 96], sizes = [1, 32], strides = [1, 1]} : vector<1x128xf32> to vector<1x32xf32>
    %cst_43 = arith.constant 5.000000e-01 : f32
    %121 = vector.broadcast %cst_43 : f32 to vector<1x32xf32>
    %122 = arith.mulf %121, %120 : vector<1x32xf32>
    %cst_44 = arith.constant 5.000000e-01 : f32
    %123 = vector.broadcast %cst_44 : f32 to vector<1x32xf32>
    %124 = arith.addf %123, %122 : vector<1x32xf32>
    %125 = arith.mulf %118, %72 : vector<1x32xf32>
    %126 = arith.mulf %113, %119 : vector<1x32xf32>
    %127 = arith.addf %125, %126 : vector<1x32xf32>
    %128 = math.tanh %127 : vector<1x32xf32>
    %129 = arith.mulf %124, %128 : vector<1x32xf32>
    %cst_45 = arith.constant dense<0.000000e+00> : vector<1x128xf32>
    %130 = tpu.matmul %129, %5, %cst_45 {dimension_numbers = #tpu.dot_dimension_numbers<[1], [0], [0], [1], [0, 0, 1, 1], [], []>} : vector<1x32xf32>, vector<32x128xf32>, vector<1x128xf32> -> vector<1x128xf32>
    %131 = vector.extract_strided_slice %20 {offsets = [1, 0], sizes = [1, 128], strides = [1, 1]} : vector<8x128xf32> to vector<1x128xf32>
    %132 = arith.addf %130, %131 : vector<1x128xf32>
    %133 = vector.extract_strided_slice %16 {offsets = [2, 0], sizes = [1, 128], strides = [1, 1]} : vector<8x128xf32> to vector<1x128xf32>
    %134 = arith.addf %133, %103 : vector<1x128xf32>
    %135 = math.tanh %134 : vector<1x128xf32>
    %136 = vector.extract_strided_slice %135 {offsets = [0, 0], sizes = [1, 32], strides = [1, 1]} : vector<1x128xf32> to vector<1x32xf32>
    %cst_46 = arith.constant 5.000000e-01 : f32
    %137 = vector.broadcast %cst_46 : f32 to vector<1x32xf32>
    %138 = arith.mulf %137, %136 : vector<1x32xf32>
    %cst_47 = arith.constant 5.000000e-01 : f32
    %139 = vector.broadcast %cst_47 : f32 to vector<1x32xf32>
    %140 = arith.addf %139, %138 : vector<1x32xf32>
    %141 = vector.extract_strided_slice %135 {offsets = [0, 32], sizes = [1, 32], strides = [1, 1]} : vector<1x128xf32> to vector<1x32xf32>
    %cst_48 = arith.constant 5.000000e-01 : f32
    %142 = vector.broadcast %cst_48 : f32 to vector<1x32xf32>
    %143 = arith.mulf %142, %141 : vector<1x32xf32>
    %cst_49 = arith.constant 5.000000e-01 : f32
    %144 = vector.broadcast %cst_49 : f32 to vector<1x32xf32>
    %145 = arith.addf %144, %143 : vector<1x32xf32>
    %146 = vector.extract_strided_slice %135 {offsets = [0, 64], sizes = [1, 32], strides = [1, 1]} : vector<1x128xf32> to vector<1x32xf32>
    %147 = vector.extract_strided_slice %135 {offsets = [0, 96], sizes = [1, 32], strides = [1, 1]} : vector<1x128xf32> to vector<1x32xf32>
    %cst_50 = arith.constant 5.000000e-01 : f32
    %148 = vector.broadcast %cst_50 : f32 to vector<1x32xf32>
    %149 = arith.mulf %148, %147 : vector<1x32xf32>
    %cst_51 = arith.constant 5.000000e-01 : f32
    %150 = vector.broadcast %cst_51 : f32 to vector<1x32xf32>
    %151 = arith.addf %150, %149 : vector<1x32xf32>
    %152 = arith.mulf %145, %99 : vector<1x32xf32>
    %153 = arith.mulf %140, %146 : vector<1x32xf32>
    %154 = arith.addf %152, %153 : vector<1x32xf32>
    %155 = math.tanh %154 : vector<1x32xf32>
    %156 = arith.mulf %151, %155 : vector<1x32xf32>
    %cst_52 = arith.constant dense<0.000000e+00> : vector<1x256xf32>
    %157 = tpu.matmul %156, %0, %cst_52 {dimension_numbers = #tpu.dot_dimension_numbers<[1], [0], [0], [1], [0, 0, 1, 1], [], []>} : vector<1x32xf32>, vector<32x256xf32>, vector<1x256xf32> -> vector<1x256xf32>
    %158 = vector.extract_strided_slice %157 {offsets = [0, 0], sizes = [1, 128], strides = [1, 1]} : vector<1x256xf32> to vector<1x128xf32>
    %159 = vector.extract_strided_slice %157 {offsets = [0, 128], sizes = [1, 128], strides = [1, 1]} : vector<1x256xf32> to vector<1x128xf32>
    %cst_53 = arith.constant dense<0.000000e+00> : vector<1x128xf32>
    %160 = tpu.matmul %129, %1, %cst_53 {dimension_numbers = #tpu.dot_dimension_numbers<[1], [0], [0], [1], [0, 0, 1, 1], [], []>} : vector<1x32xf32>, vector<32x128xf32>, vector<1x128xf32> -> vector<1x128xf32>
    %161 = arith.addf %159, %160 : vector<1x128xf32>
    %162 = arith.addf %161, %4 : vector<1x128xf32>
    %163 = math.tanh %162 : vector<1x128xf32>
    %164 = vector.extract_strided_slice %163 {offsets = [0, 0], sizes = [1, 32], strides = [1, 1]} : vector<1x128xf32> to vector<1x32xf32>
    %cst_54 = arith.constant 5.000000e-01 : f32
    %165 = vector.broadcast %cst_54 : f32 to vector<1x32xf32>
    %166 = arith.mulf %165, %164 : vector<1x32xf32>
    %cst_55 = arith.constant 5.000000e-01 : f32
    %167 = vector.broadcast %cst_55 : f32 to vector<1x32xf32>
    %168 = arith.addf %167, %166 : vector<1x32xf32>
    %169 = vector.extract_strided_slice %163 {offsets = [0, 32], sizes = [1, 32], strides = [1, 1]} : vector<1x128xf32> to vector<1x32xf32>
    %cst_56 = arith.constant 5.000000e-01 : f32
    %170 = vector.broadcast %cst_56 : f32 to vector<1x32xf32>
    %171 = arith.mulf %170, %169 : vector<1x32xf32>
    %cst_57 = arith.constant 5.000000e-01 : f32
    %172 = vector.broadcast %cst_57 : f32 to vector<1x32xf32>
    %173 = arith.addf %172, %171 : vector<1x32xf32>
    %174 = vector.extract_strided_slice %163 {offsets = [0, 64], sizes = [1, 32], strides = [1, 1]} : vector<1x128xf32> to vector<1x32xf32>
    %175 = vector.extract_strided_slice %163 {offsets = [0, 96], sizes = [1, 32], strides = [1, 1]} : vector<1x128xf32> to vector<1x32xf32>
    %cst_58 = arith.constant 5.000000e-01 : f32
    %176 = vector.broadcast %cst_58 : f32 to vector<1x32xf32>
    %177 = arith.mulf %176, %175 : vector<1x32xf32>
    %cst_59 = arith.constant 5.000000e-01 : f32
    %178 = vector.broadcast %cst_59 : f32 to vector<1x32xf32>
    %179 = arith.addf %178, %177 : vector<1x32xf32>
    %180 = arith.mulf %173, %127 : vector<1x32xf32>
    %181 = arith.mulf %168, %174 : vector<1x32xf32>
    %182 = arith.addf %180, %181 : vector<1x32xf32>
    %183 = math.tanh %182 : vector<1x32xf32>
    %184 = arith.mulf %179, %183 : vector<1x32xf32>
    %cst_60 = arith.constant dense<0.000000e+00> : vector<1x128xf32>
    %185 = tpu.matmul %184, %5, %cst_60 {dimension_numbers = #tpu.dot_dimension_numbers<[1], [0], [0], [1], [0, 0, 1, 1], [], []>} : vector<1x32xf32>, vector<32x128xf32>, vector<1x128xf32> -> vector<1x128xf32>
    %186 = vector.extract_strided_slice %20 {offsets = [2, 0], sizes = [1, 128], strides = [1, 1]} : vector<8x128xf32> to vector<1x128xf32>
    %187 = arith.addf %185, %186 : vector<1x128xf32>
    %188 = vector.extract_strided_slice %16 {offsets = [3, 0], sizes = [1, 128], strides = [1, 1]} : vector<8x128xf32> to vector<1x128xf32>
    %189 = arith.addf %188, %158 : vector<1x128xf32>
    %190 = math.tanh %189 : vector<1x128xf32>
    %191 = vector.extract_strided_slice %190 {offsets = [0, 0], sizes = [1, 32], strides = [1, 1]} : vector<1x128xf32> to vector<1x32xf32>
    %cst_61 = arith.constant 5.000000e-01 : f32
    %192 = vector.broadcast %cst_61 : f32 to vector<1x32xf32>
    %193 = arith.mulf %192, %191 : vector<1x32xf32>
    %cst_62 = arith.constant 5.000000e-01 : f32
    %194 = vector.broadcast %cst_62 : f32 to vector<1x32xf32>
    %195 = arith.addf %194, %193 : vector<1x32xf32>
    %196 = vector.extract_strided_slice %190 {offsets = [0, 32], sizes = [1, 32], strides = [1, 1]} : vector<1x128xf32> to vector<1x32xf32>
    %cst_63 = arith.constant 5.000000e-01 : f32
    %197 = vector.broadcast %cst_63 : f32 to vector<1x32xf32>
    %198 = arith.mulf %197, %196 : vector<1x32xf32>
    %cst_64 = arith.constant 5.000000e-01 : f32
    %199 = vector.broadcast %cst_64 : f32 to vector<1x32xf32>
    %200 = arith.addf %199, %198 : vector<1x32xf32>
    %201 = vector.extract_strided_slice %190 {offsets = [0, 64], sizes = [1, 32], strides = [1, 1]} : vector<1x128xf32> to vector<1x32xf32>
    %202 = vector.extract_strided_slice %190 {offsets = [0, 96], sizes = [1, 32], strides = [1, 1]} : vector<1x128xf32> to vector<1x32xf32>
    %cst_65 = arith.constant 5.000000e-01 : f32
    %203 = vector.broadcast %cst_65 : f32 to vector<1x32xf32>
    %204 = arith.mulf %203, %202 : vector<1x32xf32>
    %cst_66 = arith.constant 5.000000e-01 : f32
    %205 = vector.broadcast %cst_66 : f32 to vector<1x32xf32>
    %206 = arith.addf %205, %204 : vector<1x32xf32>
    %207 = arith.mulf %200, %154 : vector<1x32xf32>
    %208 = arith.mulf %195, %201 : vector<1x32xf32>
    %209 = arith.addf %207, %208 : vector<1x32xf32>
    %210 = math.tanh %209 : vector<1x32xf32>
    %211 = arith.mulf %206, %210 : vector<1x32xf32>
    %cst_67 = arith.constant dense<0.000000e+00> : vector<1x256xf32>
    %212 = tpu.matmul %211, %0, %cst_67 {dimension_numbers = #tpu.dot_dimension_numbers<[1], [0], [0], [1], [0, 0, 1, 1], [], []>} : vector<1x32xf32>, vector<32x256xf32>, vector<1x256xf32> -> vector<1x256xf32>
    %213 = vector.extract_strided_slice %212 {offsets = [0, 0], sizes = [1, 128], strides = [1, 1]} : vector<1x256xf32> to vector<1x128xf32>
    %214 = vector.extract_strided_slice %212 {offsets = [0, 128], sizes = [1, 128], strides = [1, 1]} : vector<1x256xf32> to vector<1x128xf32>
    %cst_68 = arith.constant dense<0.000000e+00> : vector<1x128xf32>
    %215 = tpu.matmul %184, %1, %cst_68 {dimension_numbers = #tpu.dot_dimension_numbers<[1], [0], [0], [1], [0, 0, 1, 1], [], []>} : vector<1x32xf32>, vector<32x128xf32>, vector<1x128xf32> -> vector<1x128xf32>
    %216 = arith.addf %214, %215 : vector<1x128xf32>
    %217 = arith.addf %216, %4 : vector<1x128xf32>
    %218 = math.tanh %217 : vector<1x128xf32>
    %219 = vector.extract_strided_slice %218 {offsets = [0, 0], sizes = [1, 32], strides = [1, 1]} : vector<1x128xf32> to vector<1x32xf32>
    %cst_69 = arith.constant 5.000000e-01 : f32
    %220 = vector.broadcast %cst_69 : f32 to vector<1x32xf32>
    %221 = arith.mulf %220, %219 : vector<1x32xf32>
    %cst_70 = arith.constant 5.000000e-01 : f32
    %222 = vector.broadcast %cst_70 : f32 to vector<1x32xf32>
    %223 = arith.addf %222, %221 : vector<1x32xf32>
    %224 = vector.extract_strided_slice %218 {offsets = [0, 32], sizes = [1, 32], strides = [1, 1]} : vector<1x128xf32> to vector<1x32xf32>
    %cst_71 = arith.constant 5.000000e-01 : f32
    %225 = vector.broadcast %cst_71 : f32 to vector<1x32xf32>
    %226 = arith.mulf %225, %224 : vector<1x32xf32>
    %cst_72 = arith.constant 5.000000e-01 : f32
    %227 = vector.broadcast %cst_72 : f32 to vector<1x32xf32>
    %228 = arith.addf %227, %226 : vector<1x32xf32>
    %229 = vector.extract_strided_slice %218 {offsets = [0, 64], sizes = [1, 32], strides = [1, 1]} : vector<1x128xf32> to vector<1x32xf32>
    %230 = vector.extract_strided_slice %218 {offsets = [0, 96], sizes = [1, 32], strides = [1, 1]} : vector<1x128xf32> to vector<1x32xf32>
    %cst_73 = arith.constant 5.000000e-01 : f32
    %231 = vector.broadcast %cst_73 : f32 to vector<1x32xf32>
    %232 = arith.mulf %231, %230 : vector<1x32xf32>
    %cst_74 = arith.constant 5.000000e-01 : f32
    %233 = vector.broadcast %cst_74 : f32 to vector<1x32xf32>
    %234 = arith.addf %233, %232 : vector<1x32xf32>
    %235 = arith.mulf %228, %182 : vector<1x32xf32>
    %236 = arith.mulf %223, %229 : vector<1x32xf32>
    %237 = arith.addf %235, %236 : vector<1x32xf32>
    %238 = math.tanh %237 : vector<1x32xf32>
    %239 = arith.mulf %234, %238 : vector<1x32xf32>
    %cst_75 = arith.constant dense<0.000000e+00> : vector<1x128xf32>
    %240 = tpu.matmul %239, %5, %cst_75 {dimension_numbers = #tpu.dot_dimension_numbers<[1], [0], [0], [1], [0, 0, 1, 1], [], []>} : vector<1x32xf32>, vector<32x128xf32>, vector<1x128xf32> -> vector<1x128xf32>
    %241 = vector.extract_strided_slice %20 {offsets = [3, 0], sizes = [1, 128], strides = [1, 1]} : vector<8x128xf32> to vector<1x128xf32>
    %242 = arith.addf %240, %241 : vector<1x128xf32>
    %243 = vector.extract_strided_slice %16 {offsets = [4, 0], sizes = [1, 128], strides = [1, 1]} : vector<8x128xf32> to vector<1x128xf32>
    %244 = arith.addf %243, %213 : vector<1x128xf32>
    %245 = math.tanh %244 : vector<1x128xf32>
    %246 = vector.extract_strided_slice %245 {offsets = [0, 0], sizes = [1, 32], strides = [1, 1]} : vector<1x128xf32> to vector<1x32xf32>
    %cst_76 = arith.constant 5.000000e-01 : f32
    %247 = vector.broadcast %cst_76 : f32 to vector<1x32xf32>
    %248 = arith.mulf %247, %246 : vector<1x32xf32>
    %cst_77 = arith.constant 5.000000e-01 : f32
    %249 = vector.broadcast %cst_77 : f32 to vector<1x32xf32>
    %250 = arith.addf %249, %248 : vector<1x32xf32>
    %251 = vector.extract_strided_slice %245 {offsets = [0, 32], sizes = [1, 32], strides = [1, 1]} : vector<1x128xf32> to vector<1x32xf32>
    %cst_78 = arith.constant 5.000000e-01 : f32
    %252 = vector.broadcast %cst_78 : f32 to vector<1x32xf32>
    %253 = arith.mulf %252, %251 : vector<1x32xf32>
    %cst_79 = arith.constant 5.000000e-01 : f32
    %254 = vector.broadcast %cst_79 : f32 to vector<1x32xf32>
    %255 = arith.addf %254, %253 : vector<1x32xf32>
    %256 = vector.extract_strided_slice %245 {offsets = [0, 64], sizes = [1, 32], strides = [1, 1]} : vector<1x128xf32> to vector<1x32xf32>
    %257 = vector.extract_strided_slice %245 {offsets = [0, 96], sizes = [1, 32], strides = [1, 1]} : vector<1x128xf32> to vector<1x32xf32>
    %cst_80 = arith.constant 5.000000e-01 : f32
    %258 = vector.broadcast %cst_80 : f32 to vector<1x32xf32>
    %259 = arith.mulf %258, %257 : vector<1x32xf32>
    %cst_81 = arith.constant 5.000000e-01 : f32
    %260 = vector.broadcast %cst_81 : f32 to vector<1x32xf32>
    %261 = arith.addf %260, %259 : vector<1x32xf32>
    %262 = arith.mulf %255, %209 : vector<1x32xf32>
    %263 = arith.mulf %250, %256 : vector<1x32xf32>
    %264 = arith.addf %262, %263 : vector<1x32xf32>
    %265 = math.tanh %264 : vector<1x32xf32>
    %266 = arith.mulf %261, %265 : vector<1x32xf32>
    %cst_82 = arith.constant dense<0.000000e+00> : vector<1x256xf32>
    %267 = tpu.matmul %266, %0, %cst_82 {dimension_numbers = #tpu.dot_dimension_numbers<[1], [0], [0], [1], [0, 0, 1, 1], [], []>} : vector<1x32xf32>, vector<32x256xf32>, vector<1x256xf32> -> vector<1x256xf32>
    %268 = vector.extract_strided_slice %267 {offsets = [0, 0], sizes = [1, 128], strides = [1, 1]} : vector<1x256xf32> to vector<1x128xf32>
    %269 = vector.extract_strided_slice %267 {offsets = [0, 128], sizes = [1, 128], strides = [1, 1]} : vector<1x256xf32> to vector<1x128xf32>
    %cst_83 = arith.constant dense<0.000000e+00> : vector<1x128xf32>
    %270 = tpu.matmul %239, %1, %cst_83 {dimension_numbers = #tpu.dot_dimension_numbers<[1], [0], [0], [1], [0, 0, 1, 1], [], []>} : vector<1x32xf32>, vector<32x128xf32>, vector<1x128xf32> -> vector<1x128xf32>
    %271 = arith.addf %269, %270 : vector<1x128xf32>
    %272 = arith.addf %271, %4 : vector<1x128xf32>
    %273 = math.tanh %272 : vector<1x128xf32>
    %274 = vector.extract_strided_slice %273 {offsets = [0, 0], sizes = [1, 32], strides = [1, 1]} : vector<1x128xf32> to vector<1x32xf32>
    %cst_84 = arith.constant 5.000000e-01 : f32
    %275 = vector.broadcast %cst_84 : f32 to vector<1x32xf32>
    %276 = arith.mulf %275, %274 : vector<1x32xf32>
    %cst_85 = arith.constant 5.000000e-01 : f32
    %277 = vector.broadcast %cst_85 : f32 to vector<1x32xf32>
    %278 = arith.addf %277, %276 : vector<1x32xf32>
    %279 = vector.extract_strided_slice %273 {offsets = [0, 32], sizes = [1, 32], strides = [1, 1]} : vector<1x128xf32> to vector<1x32xf32>
    %cst_86 = arith.constant 5.000000e-01 : f32
    %280 = vector.broadcast %cst_86 : f32 to vector<1x32xf32>
    %281 = arith.mulf %280, %279 : vector<1x32xf32>
    %cst_87 = arith.constant 5.000000e-01 : f32
    %282 = vector.broadcast %cst_87 : f32 to vector<1x32xf32>
    %283 = arith.addf %282, %281 : vector<1x32xf32>
    %284 = vector.extract_strided_slice %273 {offsets = [0, 64], sizes = [1, 32], strides = [1, 1]} : vector<1x128xf32> to vector<1x32xf32>
    %285 = vector.extract_strided_slice %273 {offsets = [0, 96], sizes = [1, 32], strides = [1, 1]} : vector<1x128xf32> to vector<1x32xf32>
    %cst_88 = arith.constant 5.000000e-01 : f32
    %286 = vector.broadcast %cst_88 : f32 to vector<1x32xf32>
    %287 = arith.mulf %286, %285 : vector<1x32xf32>
    %cst_89 = arith.constant 5.000000e-01 : f32
    %288 = vector.broadcast %cst_89 : f32 to vector<1x32xf32>
    %289 = arith.addf %288, %287 : vector<1x32xf32>
    %290 = arith.mulf %283, %237 : vector<1x32xf32>
    %291 = arith.mulf %278, %284 : vector<1x32xf32>
    %292 = arith.addf %290, %291 : vector<1x32xf32>
    %293 = math.tanh %292 : vector<1x32xf32>
    %294 = arith.mulf %289, %293 : vector<1x32xf32>
    %cst_90 = arith.constant dense<0.000000e+00> : vector<1x128xf32>
    %295 = tpu.matmul %294, %5, %cst_90 {dimension_numbers = #tpu.dot_dimension_numbers<[1], [0], [0], [1], [0, 0, 1, 1], [], []>} : vector<1x32xf32>, vector<32x128xf32>, vector<1x128xf32> -> vector<1x128xf32>
    %296 = vector.extract_strided_slice %20 {offsets = [4, 0], sizes = [1, 128], strides = [1, 1]} : vector<8x128xf32> to vector<1x128xf32>
    %297 = arith.addf %295, %296 : vector<1x128xf32>
    %298 = vector.extract_strided_slice %16 {offsets = [5, 0], sizes = [1, 128], strides = [1, 1]} : vector<8x128xf32> to vector<1x128xf32>
    %299 = arith.addf %298, %268 : vector<1x128xf32>
    %300 = math.tanh %299 : vector<1x128xf32>
    %301 = vector.extract_strided_slice %300 {offsets = [0, 0], sizes = [1, 32], strides = [1, 1]} : vector<1x128xf32> to vector<1x32xf32>
    %cst_91 = arith.constant 5.000000e-01 : f32
    %302 = vector.broadcast %cst_91 : f32 to vector<1x32xf32>
    %303 = arith.mulf %302, %301 : vector<1x32xf32>
    %cst_92 = arith.constant 5.000000e-01 : f32
    %304 = vector.broadcast %cst_92 : f32 to vector<1x32xf32>
    %305 = arith.addf %304, %303 : vector<1x32xf32>
    %306 = vector.extract_strided_slice %300 {offsets = [0, 32], sizes = [1, 32], strides = [1, 1]} : vector<1x128xf32> to vector<1x32xf32>
    %cst_93 = arith.constant 5.000000e-01 : f32
    %307 = vector.broadcast %cst_93 : f32 to vector<1x32xf32>
    %308 = arith.mulf %307, %306 : vector<1x32xf32>
    %cst_94 = arith.constant 5.000000e-01 : f32
    %309 = vector.broadcast %cst_94 : f32 to vector<1x32xf32>
    %310 = arith.addf %309, %308 : vector<1x32xf32>
    %311 = vector.extract_strided_slice %300 {offsets = [0, 64], sizes = [1, 32], strides = [1, 1]} : vector<1x128xf32> to vector<1x32xf32>
    %312 = vector.extract_strided_slice %300 {offsets = [0, 96], sizes = [1, 32], strides = [1, 1]} : vector<1x128xf32> to vector<1x32xf32>
    %cst_95 = arith.constant 5.000000e-01 : f32
    %313 = vector.broadcast %cst_95 : f32 to vector<1x32xf32>
    %314 = arith.mulf %313, %312 : vector<1x32xf32>
    %cst_96 = arith.constant 5.000000e-01 : f32
    %315 = vector.broadcast %cst_96 : f32 to vector<1x32xf32>
    %316 = arith.addf %315, %314 : vector<1x32xf32>
    %317 = arith.mulf %310, %264 : vector<1x32xf32>
    %318 = arith.mulf %305, %311 : vector<1x32xf32>
    %319 = arith.addf %317, %318 : vector<1x32xf32>
    %320 = math.tanh %319 : vector<1x32xf32>
    %321 = arith.mulf %316, %320 : vector<1x32xf32>
    %cst_97 = arith.constant dense<0.000000e+00> : vector<1x256xf32>
    %322 = tpu.matmul %321, %0, %cst_97 {dimension_numbers = #tpu.dot_dimension_numbers<[1], [0], [0], [1], [0, 0, 1, 1], [], []>} : vector<1x32xf32>, vector<32x256xf32>, vector<1x256xf32> -> vector<1x256xf32>
    %323 = vector.extract_strided_slice %322 {offsets = [0, 0], sizes = [1, 128], strides = [1, 1]} : vector<1x256xf32> to vector<1x128xf32>
    %324 = vector.extract_strided_slice %322 {offsets = [0, 128], sizes = [1, 128], strides = [1, 1]} : vector<1x256xf32> to vector<1x128xf32>
    %cst_98 = arith.constant dense<0.000000e+00> : vector<1x128xf32>
    %325 = tpu.matmul %294, %1, %cst_98 {dimension_numbers = #tpu.dot_dimension_numbers<[1], [0], [0], [1], [0, 0, 1, 1], [], []>} : vector<1x32xf32>, vector<32x128xf32>, vector<1x128xf32> -> vector<1x128xf32>
    %326 = arith.addf %324, %325 : vector<1x128xf32>
    %327 = arith.addf %326, %4 : vector<1x128xf32>
    %328 = math.tanh %327 : vector<1x128xf32>
    %329 = vector.extract_strided_slice %328 {offsets = [0, 0], sizes = [1, 32], strides = [1, 1]} : vector<1x128xf32> to vector<1x32xf32>
    %cst_99 = arith.constant 5.000000e-01 : f32
    %330 = vector.broadcast %cst_99 : f32 to vector<1x32xf32>
    %331 = arith.mulf %330, %329 : vector<1x32xf32>
    %cst_100 = arith.constant 5.000000e-01 : f32
    %332 = vector.broadcast %cst_100 : f32 to vector<1x32xf32>
    %333 = arith.addf %332, %331 : vector<1x32xf32>
    %334 = vector.extract_strided_slice %328 {offsets = [0, 32], sizes = [1, 32], strides = [1, 1]} : vector<1x128xf32> to vector<1x32xf32>
    %cst_101 = arith.constant 5.000000e-01 : f32
    %335 = vector.broadcast %cst_101 : f32 to vector<1x32xf32>
    %336 = arith.mulf %335, %334 : vector<1x32xf32>
    %cst_102 = arith.constant 5.000000e-01 : f32
    %337 = vector.broadcast %cst_102 : f32 to vector<1x32xf32>
    %338 = arith.addf %337, %336 : vector<1x32xf32>
    %339 = vector.extract_strided_slice %328 {offsets = [0, 64], sizes = [1, 32], strides = [1, 1]} : vector<1x128xf32> to vector<1x32xf32>
    %340 = vector.extract_strided_slice %328 {offsets = [0, 96], sizes = [1, 32], strides = [1, 1]} : vector<1x128xf32> to vector<1x32xf32>
    %cst_103 = arith.constant 5.000000e-01 : f32
    %341 = vector.broadcast %cst_103 : f32 to vector<1x32xf32>
    %342 = arith.mulf %341, %340 : vector<1x32xf32>
    %cst_104 = arith.constant 5.000000e-01 : f32
    %343 = vector.broadcast %cst_104 : f32 to vector<1x32xf32>
    %344 = arith.addf %343, %342 : vector<1x32xf32>
    %345 = arith.mulf %338, %292 : vector<1x32xf32>
    %346 = arith.mulf %333, %339 : vector<1x32xf32>
    %347 = arith.addf %345, %346 : vector<1x32xf32>
    %348 = math.tanh %347 : vector<1x32xf32>
    %349 = arith.mulf %344, %348 : vector<1x32xf32>
    %cst_105 = arith.constant dense<0.000000e+00> : vector<1x128xf32>
    %350 = tpu.matmul %349, %5, %cst_105 {dimension_numbers = #tpu.dot_dimension_numbers<[1], [0], [0], [1], [0, 0, 1, 1], [], []>} : vector<1x32xf32>, vector<32x128xf32>, vector<1x128xf32> -> vector<1x128xf32>
    %351 = vector.extract_strided_slice %20 {offsets = [5, 0], sizes = [1, 128], strides = [1, 1]} : vector<8x128xf32> to vector<1x128xf32>
    %352 = arith.addf %350, %351 : vector<1x128xf32>
    %353 = vector.extract_strided_slice %16 {offsets = [6, 0], sizes = [1, 128], strides = [1, 1]} : vector<8x128xf32> to vector<1x128xf32>
    %354 = arith.addf %353, %323 : vector<1x128xf32>
    %355 = math.tanh %354 : vector<1x128xf32>
    %356 = vector.extract_strided_slice %355 {offsets = [0, 0], sizes = [1, 32], strides = [1, 1]} : vector<1x128xf32> to vector<1x32xf32>
    %cst_106 = arith.constant 5.000000e-01 : f32
    %357 = vector.broadcast %cst_106 : f32 to vector<1x32xf32>
    %358 = arith.mulf %357, %356 : vector<1x32xf32>
    %cst_107 = arith.constant 5.000000e-01 : f32
    %359 = vector.broadcast %cst_107 : f32 to vector<1x32xf32>
    %360 = arith.addf %359, %358 : vector<1x32xf32>
    %361 = vector.extract_strided_slice %355 {offsets = [0, 32], sizes = [1, 32], strides = [1, 1]} : vector<1x128xf32> to vector<1x32xf32>
    %cst_108 = arith.constant 5.000000e-01 : f32
    %362 = vector.broadcast %cst_108 : f32 to vector<1x32xf32>
    %363 = arith.mulf %362, %361 : vector<1x32xf32>
    %cst_109 = arith.constant 5.000000e-01 : f32
    %364 = vector.broadcast %cst_109 : f32 to vector<1x32xf32>
    %365 = arith.addf %364, %363 : vector<1x32xf32>
    %366 = vector.extract_strided_slice %355 {offsets = [0, 64], sizes = [1, 32], strides = [1, 1]} : vector<1x128xf32> to vector<1x32xf32>
    %367 = vector.extract_strided_slice %355 {offsets = [0, 96], sizes = [1, 32], strides = [1, 1]} : vector<1x128xf32> to vector<1x32xf32>
    %cst_110 = arith.constant 5.000000e-01 : f32
    %368 = vector.broadcast %cst_110 : f32 to vector<1x32xf32>
    %369 = arith.mulf %368, %367 : vector<1x32xf32>
    %cst_111 = arith.constant 5.000000e-01 : f32
    %370 = vector.broadcast %cst_111 : f32 to vector<1x32xf32>
    %371 = arith.addf %370, %369 : vector<1x32xf32>
    %372 = arith.mulf %365, %319 : vector<1x32xf32>
    %373 = arith.mulf %360, %366 : vector<1x32xf32>
    %374 = arith.addf %372, %373 : vector<1x32xf32>
    %375 = math.tanh %374 : vector<1x32xf32>
    %376 = arith.mulf %371, %375 : vector<1x32xf32>
    %cst_112 = arith.constant dense<0.000000e+00> : vector<1x256xf32>
    %377 = tpu.matmul %376, %0, %cst_112 {dimension_numbers = #tpu.dot_dimension_numbers<[1], [0], [0], [1], [0, 0, 1, 1], [], []>} : vector<1x32xf32>, vector<32x256xf32>, vector<1x256xf32> -> vector<1x256xf32>
    %378 = vector.extract_strided_slice %377 {offsets = [0, 0], sizes = [1, 128], strides = [1, 1]} : vector<1x256xf32> to vector<1x128xf32>
    %379 = vector.extract_strided_slice %377 {offsets = [0, 128], sizes = [1, 128], strides = [1, 1]} : vector<1x256xf32> to vector<1x128xf32>
    %cst_113 = arith.constant dense<0.000000e+00> : vector<1x128xf32>
    %380 = tpu.matmul %349, %1, %cst_113 {dimension_numbers = #tpu.dot_dimension_numbers<[1], [0], [0], [1], [0, 0, 1, 1], [], []>} : vector<1x32xf32>, vector<32x128xf32>, vector<1x128xf32> -> vector<1x128xf32>
    %381 = arith.addf %379, %380 : vector<1x128xf32>
    %382 = arith.addf %381, %4 : vector<1x128xf32>
    %383 = math.tanh %382 : vector<1x128xf32>
    %384 = vector.extract_strided_slice %383 {offsets = [0, 0], sizes = [1, 32], strides = [1, 1]} : vector<1x128xf32> to vector<1x32xf32>
    %cst_114 = arith.constant 5.000000e-01 : f32
    %385 = vector.broadcast %cst_114 : f32 to vector<1x32xf32>
    %386 = arith.mulf %385, %384 : vector<1x32xf32>
    %cst_115 = arith.constant 5.000000e-01 : f32
    %387 = vector.broadcast %cst_115 : f32 to vector<1x32xf32>
    %388 = arith.addf %387, %386 : vector<1x32xf32>
    %389 = vector.extract_strided_slice %383 {offsets = [0, 32], sizes = [1, 32], strides = [1, 1]} : vector<1x128xf32> to vector<1x32xf32>
    %cst_116 = arith.constant 5.000000e-01 : f32
    %390 = vector.broadcast %cst_116 : f32 to vector<1x32xf32>
    %391 = arith.mulf %390, %389 : vector<1x32xf32>
    %cst_117 = arith.constant 5.000000e-01 : f32
    %392 = vector.broadcast %cst_117 : f32 to vector<1x32xf32>
    %393 = arith.addf %392, %391 : vector<1x32xf32>
    %394 = vector.extract_strided_slice %383 {offsets = [0, 64], sizes = [1, 32], strides = [1, 1]} : vector<1x128xf32> to vector<1x32xf32>
    %395 = vector.extract_strided_slice %383 {offsets = [0, 96], sizes = [1, 32], strides = [1, 1]} : vector<1x128xf32> to vector<1x32xf32>
    %cst_118 = arith.constant 5.000000e-01 : f32
    %396 = vector.broadcast %cst_118 : f32 to vector<1x32xf32>
    %397 = arith.mulf %396, %395 : vector<1x32xf32>
    %cst_119 = arith.constant 5.000000e-01 : f32
    %398 = vector.broadcast %cst_119 : f32 to vector<1x32xf32>
    %399 = arith.addf %398, %397 : vector<1x32xf32>
    %400 = arith.mulf %393, %347 : vector<1x32xf32>
    %401 = arith.mulf %388, %394 : vector<1x32xf32>
    %402 = arith.addf %400, %401 : vector<1x32xf32>
    %403 = math.tanh %402 : vector<1x32xf32>
    %404 = arith.mulf %399, %403 : vector<1x32xf32>
    %cst_120 = arith.constant dense<0.000000e+00> : vector<1x128xf32>
    %405 = tpu.matmul %404, %5, %cst_120 {dimension_numbers = #tpu.dot_dimension_numbers<[1], [0], [0], [1], [0, 0, 1, 1], [], []>} : vector<1x32xf32>, vector<32x128xf32>, vector<1x128xf32> -> vector<1x128xf32>
    %406 = vector.extract_strided_slice %20 {offsets = [6, 0], sizes = [1, 128], strides = [1, 1]} : vector<8x128xf32> to vector<1x128xf32>
    %407 = arith.addf %405, %406 : vector<1x128xf32>
    %408 = vector.extract_strided_slice %16 {offsets = [7, 0], sizes = [1, 128], strides = [1, 1]} : vector<8x128xf32> to vector<1x128xf32>
    %409 = arith.addf %408, %378 : vector<1x128xf32>
    %410 = math.tanh %409 : vector<1x128xf32>
    %411 = vector.extract_strided_slice %410 {offsets = [0, 0], sizes = [1, 32], strides = [1, 1]} : vector<1x128xf32> to vector<1x32xf32>
    %cst_121 = arith.constant 5.000000e-01 : f32
    %412 = vector.broadcast %cst_121 : f32 to vector<1x32xf32>
    %413 = arith.mulf %412, %411 : vector<1x32xf32>
    %cst_122 = arith.constant 5.000000e-01 : f32
    %414 = vector.broadcast %cst_122 : f32 to vector<1x32xf32>
    %415 = arith.addf %414, %413 : vector<1x32xf32>
    %416 = vector.extract_strided_slice %410 {offsets = [0, 32], sizes = [1, 32], strides = [1, 1]} : vector<1x128xf32> to vector<1x32xf32>
    %cst_123 = arith.constant 5.000000e-01 : f32
    %417 = vector.broadcast %cst_123 : f32 to vector<1x32xf32>
    %418 = arith.mulf %417, %416 : vector<1x32xf32>
    %cst_124 = arith.constant 5.000000e-01 : f32
    %419 = vector.broadcast %cst_124 : f32 to vector<1x32xf32>
    %420 = arith.addf %419, %418 : vector<1x32xf32>
    %421 = vector.extract_strided_slice %410 {offsets = [0, 64], sizes = [1, 32], strides = [1, 1]} : vector<1x128xf32> to vector<1x32xf32>
    %422 = vector.extract_strided_slice %410 {offsets = [0, 96], sizes = [1, 32], strides = [1, 1]} : vector<1x128xf32> to vector<1x32xf32>
    %cst_125 = arith.constant 5.000000e-01 : f32
    %423 = vector.broadcast %cst_125 : f32 to vector<1x32xf32>
    %424 = arith.mulf %423, %422 : vector<1x32xf32>
    %cst_126 = arith.constant 5.000000e-01 : f32
    %425 = vector.broadcast %cst_126 : f32 to vector<1x32xf32>
    %426 = arith.addf %425, %424 : vector<1x32xf32>
    %427 = arith.mulf %420, %374 : vector<1x32xf32>
    %428 = arith.mulf %415, %421 : vector<1x32xf32>
    %429 = arith.addf %427, %428 : vector<1x32xf32>
    %430 = math.tanh %429 : vector<1x32xf32>
    %431 = arith.mulf %426, %430 : vector<1x32xf32>
    %cst_127 = arith.constant dense<0.000000e+00> : vector<1x256xf32>
    %432 = tpu.matmul %431, %0, %cst_127 {dimension_numbers = #tpu.dot_dimension_numbers<[1], [0], [0], [1], [0, 0, 1, 1], [], []>} : vector<1x32xf32>, vector<32x256xf32>, vector<1x256xf32> -> vector<1x256xf32>
    %433 = vector.extract_strided_slice %432 {offsets = [0, 128], sizes = [1, 128], strides = [1, 1]} : vector<1x256xf32> to vector<1x128xf32>
    %cst_128 = arith.constant dense<0.000000e+00> : vector<1x128xf32>
    %434 = tpu.matmul %404, %1, %cst_128 {dimension_numbers = #tpu.dot_dimension_numbers<[1], [0], [0], [1], [0, 0, 1, 1], [], []>} : vector<1x32xf32>, vector<32x128xf32>, vector<1x128xf32> -> vector<1x128xf32>
    %435 = arith.addf %433, %434 : vector<1x128xf32>
    %436 = arith.addf %435, %4 : vector<1x128xf32>
    %437 = math.tanh %436 : vector<1x128xf32>
    %438 = vector.extract_strided_slice %437 {offsets = [0, 0], sizes = [1, 32], strides = [1, 1]} : vector<1x128xf32> to vector<1x32xf32>
    %cst_129 = arith.constant 5.000000e-01 : f32
    %439 = vector.broadcast %cst_129 : f32 to vector<1x32xf32>
    %440 = arith.mulf %439, %438 : vector<1x32xf32>
    %cst_130 = arith.constant 5.000000e-01 : f32
    %441 = vector.broadcast %cst_130 : f32 to vector<1x32xf32>
    %442 = arith.addf %441, %440 : vector<1x32xf32>
    %443 = vector.extract_strided_slice %437 {offsets = [0, 32], sizes = [1, 32], strides = [1, 1]} : vector<1x128xf32> to vector<1x32xf32>
    %cst_131 = arith.constant 5.000000e-01 : f32
    %444 = vector.broadcast %cst_131 : f32 to vector<1x32xf32>
    %445 = arith.mulf %444, %443 : vector<1x32xf32>
    %cst_132 = arith.constant 5.000000e-01 : f32
    %446 = vector.broadcast %cst_132 : f32 to vector<1x32xf32>
    %447 = arith.addf %446, %445 : vector<1x32xf32>
    %448 = vector.extract_strided_slice %437 {offsets = [0, 64], sizes = [1, 32], strides = [1, 1]} : vector<1x128xf32> to vector<1x32xf32>
    %449 = vector.extract_strided_slice %437 {offsets = [0, 96], sizes = [1, 32], strides = [1, 1]} : vector<1x128xf32> to vector<1x32xf32>
    %cst_133 = arith.constant 5.000000e-01 : f32
    %450 = vector.broadcast %cst_133 : f32 to vector<1x32xf32>
    %451 = arith.mulf %450, %449 : vector<1x32xf32>
    %cst_134 = arith.constant 5.000000e-01 : f32
    %452 = vector.broadcast %cst_134 : f32 to vector<1x32xf32>
    %453 = arith.addf %452, %451 : vector<1x32xf32>
    %454 = arith.mulf %447, %402 : vector<1x32xf32>
    %455 = arith.mulf %442, %448 : vector<1x32xf32>
    %456 = arith.addf %454, %455 : vector<1x32xf32>
    %457 = math.tanh %456 : vector<1x32xf32>
    %458 = arith.mulf %453, %457 : vector<1x32xf32>
    %cst_135 = arith.constant dense<0.000000e+00> : vector<1x128xf32>
    %459 = tpu.matmul %458, %5, %cst_135 {dimension_numbers = #tpu.dot_dimension_numbers<[1], [0], [0], [1], [0, 0, 1, 1], [], []>} : vector<1x32xf32>, vector<32x128xf32>, vector<1x128xf32> -> vector<1x128xf32>
    %460 = vector.extract_strided_slice %20 {offsets = [7, 0], sizes = [1, 128], strides = [1, 1]} : vector<8x128xf32> to vector<1x128xf32>
    %461 = arith.addf %459, %460 : vector<1x128xf32>
    %462 = tpu.concatenate %77, %132, %187, %242, %297, %352, %407, %461 in 0 : vector<1x128xf32>, vector<1x128xf32>, vector<1x128xf32>, vector<1x128xf32>, vector<1x128xf32>, vector<1x128xf32>, vector<1x128xf32>, vector<1x128xf32> -> vector<8x128xf32>
    %cst_136 = arith.constant 0.000000e+00 : f32
    %463 = vector.broadcast %cst_136 : f32 to vector<8x128xf32>
    %464 = arith.maximumf %462, %463 : vector<8x128xf32>
    %c40 = arith.constant 40 : index
    %c0_137 = arith.constant 0 : index
    %465 = vector.load %arg3[%c40, %c0_137] : memref<432x128xf32, #tpu.memory_space<vmem>>, vector<128x128xf32>
    %cst_138 = arith.constant dense<0.000000e+00> : vector<8x128xf32>
    %466 = tpu.matmul %464, %465, %cst_138 {dimension_numbers = #tpu.dot_dimension_numbers<[1], [0], [0], [1], [0, 0, 1, 1], [], []>} : vector<8x128xf32>, vector<128x128xf32>, vector<8x128xf32> -> vector<8x128xf32>
    %467 = vector.broadcast %9 : vector<1x128xf32> to vector<8x128xf32>
    %468 = arith.addf %466, %467 : vector<8x128xf32>
    %cst_139 = arith.constant 0.000000e+00 : f32
    %469 = vector.broadcast %cst_139 : f32 to vector<8x128xf32>
    %470 = arith.maximumf %468, %469 : vector<8x128xf32>
    %c168 = arith.constant 168 : index
    %c0_140 = arith.constant 0 : index
    %471 = vector.load %arg3[%c168, %c0_140] : memref<432x128xf32, #tpu.memory_space<vmem>>, vector<128x128xf32>
    %cst_141 = arith.constant dense<0.000000e+00> : vector<8x128xf32>
    %472 = tpu.matmul %470, %471, %cst_141 {dimension_numbers = #tpu.dot_dimension_numbers<[1], [0], [0], [1], [0, 0, 1, 1], [], []>} : vector<8x128xf32>, vector<128x128xf32>, vector<8x128xf32> -> vector<8x128xf32>
    %473 = vector.broadcast %10 : vector<1x128xf32> to vector<8x128xf32>
    %474 = arith.addf %472, %473 : vector<8x128xf32>
    %cst_142 = arith.constant 0.000000e+00 : f32
    %475 = vector.broadcast %cst_142 : f32 to vector<8x128xf32>
    %476 = arith.maximumf %474, %475 : vector<8x128xf32>
    %c296 = arith.constant 296 : index
    %c0_143 = arith.constant 0 : index
    %477 = vector.load %arg3[%c296, %c0_143] : memref<432x128xf32, #tpu.memory_space<vmem>>, vector<128x128xf32>
    %cst_144 = arith.constant dense<0.000000e+00> : vector<8x128xf32>
    %478 = tpu.matmul %476, %477, %cst_144 {dimension_numbers = #tpu.dot_dimension_numbers<[1], [0], [0], [1], [0, 0, 1, 1], [], []>} : vector<8x128xf32>, vector<128x128xf32>, vector<8x128xf32> -> vector<8x128xf32>
    %479 = vector.broadcast %11 : vector<1x128xf32> to vector<8x128xf32>
    %480 = arith.addf %478, %479 : vector<8x128xf32>
    %481 = vector.extract_strided_slice %480 {offsets = [0, 0], sizes = [8, 1], strides = [1, 1]} : vector<8x128xf32> to vector<8x1xf32>
    %c0_145 = arith.constant 0 : index
    %c0_146 = arith.constant 0 : index
    %482 = vector.load %arg4[%c0_145, %c0_146] : memref<8x1xf32, #tpu.memory_space<vmem>>, vector<8x1xf32>
    tpu.vector_store %arg4[%c0_145, %c0_146], %481 {strides = array<i32>} : memref<8x1xf32, #tpu.memory_space<vmem>>, vector<8x1xf32>,
    return
  }
}

</mosaic_0001>

<bundles_post_ra>
// kernel: tpu_custom_call.1
= control target key start
LH: loop header
LB: loop body
LE: loop exit
PB: predicated region body
PF: predicated region fallthrough
CT: control target
= control target key end

     0   :  { %9 = vsyncpa [#allocation3], 0  ;;  %s4083_s0 = inlined_call_operand.hbm [shape: f32[8,16], index: 0, kind: input, shape index: {}]   ;;  %s4084_s1 = inlined_call_operand.hbm [shape: f32[8,8], index: 1, kind: input, shape index: {}]   ;;  %s4085_s2 = inlined_call_operand.hbm [shape: f32[88,256], index: 2, kind: input, shape index: {}]   ;;  %s4086_s3 = inlined_call_operand.hbm [shape: f32[432,128], index: 3, kind: input, shape index: {}]   ;;  %s4087_s4 = inlined_call_operand.vmem [shape: f32[8,1], index: 4, kind: output, shape index: {}]  }
   0x1   :  { %10 = vsyncpa [#allocation5], 0 }
   0x2   :  { %11 = vsyncpa [#allocation8], 0  ;;  %s3606_s15 = smov [#allocation4]   ;;  %s3607_s17 = smov [#allocation2]  }
   0x3   :  { %s28_s16 = sshll.u32 %s3606_s15, 4  ;;  %s18_s18 = sshll.u32 %s3607_s17, 4  ;;  %s29_s16 = int_to_ptr.vmem [resolvable:$true] %s28_s16  ;;  %s19_s18 = int_to_ptr.vmem [resolvable:$true] %s18_s18 }
   0x4   :  { %s3512_s21 = scalar_lea.hbm %s4084_s1, 128 }
   0x5   :  { %p3513_p0 = scmp.ne.s32.totalorder %s4084_s1, %s3512_s21  ;;  %p3516_p1 = scmp.lt.u32.totalorder %s3512_s21, %s4084_s1 }
   0x7   :  { %p3518_p2 = pnand %p3516_p1, %p3513_p0 }
   0x9   :  { %3521 = shalt.err (!%p3518_p2)
}
   0xa   :  { %s3522_s26 = scalar_lea.vmem %s29_s16, 128  ;;  %p3527_p4 = scmp.lt.s32.totalorder %s29_s16, %s29_s16 }
   0xb   :  { %p3523_p3 = scmp.ne.s32.totalorder %s29_s16, %s3522_s26  ;;  %p3528_p5 = scmp.lt.s32.totalorder %s3522_s26, %s3522_s26 }
   0xd   :  { %p3529_p6 = por %p3528_p5, %p3527_p4 }
   0xf   :  { %p3530_p7 = pnand %p3529_p6, %p3523_p3 }
  0x11   :  { %3533 = shalt.err (!%p3530_p7)
}
  0x12   :  { %31 = dma.hbm_to_vmem [thread:$0]  %s4084_s1, 128, %s29_s16, [#allocation5]  }
  0x13   :  { %s3534_s5 = scalar_lea.hbm %s4083_s0, 128 }
  0x14   :  { %p3535_p8 = scmp.ne.s32.totalorder %s4083_s0, %s3534_s5  ;;  %p3538_p9 = scmp.lt.u32.totalorder %s3534_s5, %s4083_s0 }
  0x16   :  { %p3540_p10 = pnand %p3538_p9, %p3535_p8 }
  0x18   :  { %3543 = shalt.err (!%p3540_p10)
}
  0x19   :  { %s3544_s10 = scalar_lea.vmem %s19_s18, 128  ;;  %p3549_p12 = scmp.lt.s32.totalorder %s19_s18, %s19_s18 }
  0x1a   :  { %p3545_p11 = scmp.ne.s32.totalorder %s19_s18, %s3544_s10  ;;  %p3550_p13 = scmp.lt.s32.totalorder %s3544_s10, %s3544_s10 }
  0x1c   :  { %p3551_p0 = por %p3550_p13, %p3549_p12 }
  0x1e   :  { %p3552_p1 = pnand %p3551_p0, %p3545_p11 }
  0x20   :  { %3555 = shalt.err (!%p3552_p1)
}
  0x21   :  { %21 = dma.hbm_to_vmem [thread:$0]  %s4083_s0, 128, %s19_s18, [#allocation3]  }
  0x22   :  { %s3608_s12 = smov [#allocation6]   ;;  %s3556_s16 = scalar_lea.hbm %s4085_s2, 2816 }
  0x23   :  { %s37_s13 = sshll.u32 %s3608_s12, 4  ;;  %p3557_p2 = scmp.ne.s32.totalorder %s4085_s2, %s3556_s16  ;;  %s38_s13 = int_to_ptr.vmem [resolvable:$true] %s37_s13 }
  0x24   :  { %p3560_p3 = scmp.lt.u32.totalorder %s3556_s16, %s4085_s2 }
  0x26   :  { %p3562_p4 = pnand %p3560_p3, %p3557_p2 }
  0x28   :  { %3565 = shalt.err (!%p3562_p4)
}
  0x29   :  { %s3566_s22 = scalar_lea.vmem %s38_s13, 2816  ;;  %p3571_p6 = scmp.lt.s32.totalorder %s38_s13, %s38_s13 }
  0x2a   :  { %p3567_p5 = scmp.ne.s32.totalorder %s38_s13, %s3566_s22  ;;  %p3572_p7 = scmp.lt.s32.totalorder %s3566_s22, %s3566_s22 }
  0x2c   :  { %p3573_p8 = por %p3572_p7, %p3571_p6 }
  0x2e   :  { %p3574_p9 = pnand %p3573_p8, %p3567_p5 }
  0x30   :  { %3577 = shalt.err (!%p3574_p9)
}
  0x31   :  { %s3609_s0 = smov 256   ;;  %s3610_s18 = smov 16  }
  0x32   :  { %43 = dma.hbm_to_vmem [thread:$0]  %s4085_s2, 2816, %s38_s13, [#allocation5], %s3609_s0, %s3609_s0, %s3610_s18  }
  0x33   :  { %s3611_s25 = smov [#allocation7]   ;;  %s3578_s29 = scalar_lea.hbm %s4086_s3, 6912 }
  0x34   :  { %s49_s26 = sshll.u32 %s3611_s25, 4  ;;  %p3579_p10 = scmp.ne.s32.totalorder %s4086_s3, %s3578_s29  ;;  %s50_s26 = int_to_ptr.vmem [resolvable:$true] %s49_s26 }
  0x35   :  { %p3582_p11 = scmp.lt.u32.totalorder %s3578_s29, %s4086_s3 }
  0x37   :  { %p3584_p12 = pnand %p3582_p11, %p3579_p10 }
  0x39   :  { %3587 = shalt.err (!%p3584_p12)
}
  0x3a   :  { %s3588_s8 = scalar_lea.vmem %s50_s26, 6912  ;;  %p3593_p0 = scmp.lt.s32.totalorder %s50_s26, %s50_s26 }
  0x3b   :  { %p3589_p13 = scmp.ne.s32.totalorder %s50_s26, %s3588_s8  ;;  %p3594_p1 = scmp.lt.s32.totalorder %s3588_s8, %s3588_s8 }
  0x3d   :  { %p3595_p2 = por %p3594_p1, %p3593_p0 }
  0x3f   :  { %p3596_p3 = pnand %p3595_p2, %p3589_p13 }
  0x41   :  { %3599 = shalt.err (!%p3596_p3)
}
  0x42   :  { %s3612_s2 = smov 128   ;;  %s3613_s9 = smov 8  }
  0x43   :  { %55 = dma.hbm_to_vmem [thread:$0]  %s4086_s3, 6912, %s50_s26, [#allocation8], %s3612_s2, %s3612_s2, %s3613_s9  }
  0x44   :  { %3600 = dma.done.wait [#allocation3], 128  }
  0x45   :  { %3601 = vsyncadd [#allocation3], 4294967168 }
  0x46   :  { %3602 = dma.done.wait [#allocation5], 2944  }
  0x47   :  { %3603 = vsyncadd [#allocation5], 4294964352 }
  0x48   :  { %3604 = dma.done.wait [#allocation8], 6912  }
  0x49   :  { %3605 = vsyncadd [#allocation8], 4294960384  ;;  %v3614_v0 = vmov 0.0|0.0   ;;  %vm3615_vm0 = vmmov 0   ;;  %v3616_v1 = vmov 0.0   ;;  %v80_v2 = vld [vmem:[#allocation6 + $0x80] sm:$0xff]  ;;  %v91_v6 = vlaneseq }
  0x4a   :  { %3198 = vmatprep.subr.bf16.mxu0 %v3614_v0  ;;  %2909 = vmatprep.mubr.msk.f32.mxu0 %vm3615_vm0, %v3616_v1  ;;  %v81_v3 = vld [vmem:[#allocation6 + $0x90] sm:$0xff]  ;;  %vm95_vm1 = vcmask 130048   ;;  %v82_v9 = vld [vmem:[#allocation6 + $0xa0] sm:$0xff]  ;;  %s3617_s3 = smov 64   ;;  %s3618_s11 = smov 32   ;;  %v69_v22 = vld [vmem:[#allocation6 + $0x8] sm:$0xff] }
  0x4b   :  { %2912 = vmatprep.subr.mxu1 %v3616_v1  ;;  %2914 = vmatprep.mubr.msk.f32.mxu1 %vm3615_vm0, %v3616_v1  ;;  %v3199_v4 = vpack.c.bf16 %v81_v3, %v80_v2  ;;  %v90_v5 = vld [vmem:[#allocation2] sm:$0xff]  ;;  %v3699_v7 = vshrl.u32 %v91_v6, 7  ;;  %v71_v23 = vld [vmem:[#allocation6 + $0x18] sm:$0xff]  ;;  %v68_v24 = vld [vmem:[#allocation6] sm:$0xff]  ;;  %vm272_vm2 = vcmask 261120   ;;  %vm174_vm3 = vcmask 64512  }
  0x4c   :  { %v3712_v25 = vpack.c.bf16 %v71_v23, %v69_v22  ;;  %v70_v26 = vld [vmem:[#allocation6 + $0x10] sm:$0xff]  ;;  %v73_v27 = vld [vmem:[#allocation6 + $0x28] sm:$0xff]  ;;  %v75_v28 = vld [vmem:[#allocation6 + $0x38] sm:$0xff]  ;;  %vm2448_vm4 = vcmask 1040384   ;;  %vm2450_vm5 = vcmask 1041408   ;;  %vm2452_vm6 = vcmask 1042432  }
  0x4d   :  { %3200 = vmatpush3.bf16.msra.mxu0 %v3199_v4  ;;  %v93_v8 = vsub.s32 0, %v3699_v7  ;;  %v3714_v29 = vpack.c.bf16 %v70_v26, %v68_v24  ;;  %v3716_v30 = vpack.c.bf16 %v75_v28, %v73_v27  ;;  %v72_v31 = vld [vmem:[#allocation6 + $0x20] sm:$0xff]  ;;  %v74_v32 = vld [vmem:[#allocation6 + $0x30] sm:$0xff]  ;;  %v3742_v48 = vld [vmem:[#allocation6 + $0xa8] sm:$0xff]  ;;  %vm2454_vm7 = vcmask 1043456  }
  0x4e   :  { %3202 = vmatprep.subr.bf16.mxu0 %v3712_v25  ;;  %v3720_v33 = vpack.c.bf16 %v74_v32, %v72_v31  ;;  %v76_v37 = vld [vmem:[#allocation6 + $0x40] sm:$0xff]  ;;  %v77_v38 = vld [vmem:[#allocation6 + $0x50] sm:$0xff]  ;;  %vm2456_vm8 = vcmask 1044480   ;;  %vm2458_vm9 = vcmask 1045504   ;;  %vm2460_vm10 = vcmask 1046528  }
  0x4f   :  { %v94_v10 = vrot.slane %v82_v9, %v93_v8  ;;  %v3727_v39 = vpack.c.bf16 %v77_v38, %v76_v37  ;;  %v78_v40 = vld [vmem:[#allocation6 + $0x60] sm:$0xff]  ;;  %v79_v41 = vld [vmem:[#allocation6 + $0x70] sm:$0xff]  ;;  %vm2735_vm11 = vcmask 7168  }
  0x50   :  { %2910 = vmatmul.mubr.msk.f32.vlgmr.msra.gmra.mrb[0].mxu0 %vm95_vm1, %v90_v5  ;;  %v3731_v43 = vpack.c.bf16 %v79_v41, %v78_v40 }
  0x51   :  { %339 = vmatprep.mubr.f32.mxu0 %v3616_v1  ;;  %3204 = vmatpush1.bf16.msra.mxu0 %v3714_v29 }
  0x52   :  { %3206 = vmatprep.subr.bf16.mxu0 %v3716_v30 }
  0x55   :  { %3208 = vmatpush1.bf16.msra.mxu0 %v3720_v33 }
  0x56   :  { %3209 = vmatprep.subr.bf16.mxu0 %v3614_v0 }
 0x123   :  { %v165_v11 = vpop.f32.mrb[0].mxu0 }
 0x124   :  { %v3704_v12 = vadd.f32 %v165_v11, %v94_v10  ;;  %v2911_v13 = vpop.f32.mrb[1].mxu0  ;;  %v88_v10 = vld [vmem:[#allocation7 + $0x20] sm:$0xff] }
 0x125   :  { %v84_v11 = vld [vmem:[#allocation7] sm:$0xff]  ;;  %v85_v13 = vld [vmem:[#allocation7 + $0x8] sm:$0xff]  ;;  %2913 = vmatpush3.msra.mxu1 %v88_v10 }
 0x126   :  { %3446 = vtanh.f32 %v3704_v12  ;;  %3229 = vmatprep.subr.bf16.mxu1 %v3614_v0 }
 0x130   :  { %v3447_v14 = vpop.eup %3446 }
 0x131   :  { %254 = vrot.lane.b32.xlu0 %v3447_v14, %s3617_s3  ;;  %v250_v15 = vmul.f32 0.5, %v3447_v14  ;;  %v3756_v14 = vpack.c.bf16 %v85_v13, %v84_v11 }
 0x133   :  { %v251_v16 = vadd.f32 0.5, %v250_v15  ;;  %v169_v15 = vld [vmem:[#allocation4] sm:$0xff] }
 0x134   :  { %2915 = vmatmul.mubr.msk.f32.vlgmr.msra.gmra.mrb[0].mxu1 %vm174_vm3, %v169_v15 }
 0x135   :  { %v252_v19 = vmul.f32 0.0, %v251_v16  ;;  %3231 = vmatpush3.bf16.msra.mxu1 %v3727_v39  ;;  %2947 = vmatprep.mubr.msk.f32.mxu1 %vm3615_vm0, %v3616_v1 }
 0x136   :  { %3232 = vmatprep.subr.bf16.mxu1 %v3614_v0 }
 0x139   :  { %3234 = vmatpush3.bf16.msra.mxu1 %v3731_v43 }
 0x13a   :  { %3242 = vmatprep.subr.bf16.mxu1 %v3712_v25 }
 0x1a3   :  { %v255_v17 = vpop.permute.xlu0 %254 }
 0x1a4   :  { %v257_v18 = vmul.f32 %v255_v17, %v251_v16 }
 0x1a6   :  { %259 = vrot.lane.b32.xlu0 %v257_v18, %s3618_s11  ;;  %v86_v18 = vld [vmem:[#allocation7 + $0x10] sm:$0xff] }
 0x207   :  { %v244_v27 = vpop.f32.mrb[0].mxu1 }
 0x208   :  { %v2916_v28 = vpop.f32.mrb[1].mxu1 }
 0x218   :  { %v260_v20 = vpop.permute.xlu0 %259 }
 0x219   :  { %v3709_v21 = vadd.f32 %v260_v20, %v252_v19  ;;  %v87_v19 = vld [vmem:[#allocation7 + $0x18] sm:$0xff] }
 0x21a   :  { %v3769_v20 = vpack.c.bf16 %v87_v19, %v86_v18 }
 0x21b   :  { %3448 = vtanh.f32 %v3709_v21  ;;  %v524_v63 = vrot.slane %v3709_v21, 7 }
 0x225   :  { %v3449_v34 = vpop.eup %3448 }
 0x226   :  { %265 = vrot.lane.b32.xlu1 %v3449_v34, %s3617_s3  ;;  %v89_v34 = vld [vmem:[#allocation7 + $0x1a8] sm:$0xff] }
 0x298   :  { %v266_v35 = vpop.permute.xlu1 %265 }
 0x299   :  { %v268_v36 = vmul.f32 %v266_v35, %v251_v16  ;;  %v173_v35 = vrot.slane %v89_v34, %v93_v8 }
 0x29b   :  { %270 = vrot.lane.b32.xlu1 %v268_v36, %s3618_s11  ;;  %v3796_v36 = vadd.f32 %v244_v27, %v173_v35 }
 0x29d   :  { %v716_v18 = vrot.slane %v3796_v36, 1 }
 0x30d   :  { %v271_v42 = vpop.permute.xlu1 %270 }
 0x30e   :  { %2746 = vmatmul.mubr.msk.f32.vlgmr.msra.gmra.mrb[2].mxu0 %vm272_vm2, %v271_v42 }
 0x30f   :  { %3211 = vmatpush3.bf16.msra.mxu0 %v3727_v39  ;;  %2925 = vmatprep.mubr.msk.f32.mxu0 %vm3615_vm0, %v3616_v1 }
 0x310   :  { %3212 = vmatprep.subr.bf16.mxu0 %v3614_v0 }
 0x313   :  { %3214 = vmatpush3.bf16.msra.mxu0 %v3731_v43 }
 0x314   :  { %3215 = vmatprep.subr.bf16.mxu0 %v3614_v0 }
 0x316   :  { %2926 = vmatmul.mubr.f32.vlgmr.msra.gmra.mrb[4].mxu0 %v3616_v1 }
 0x317   :  { %2936 = vmatprep.mubr.msk.f32.mxu0 %vm3615_vm0, %v3616_v1  ;;  %3217 = vmatpush3.bf16.msra.mxu0 %v3756_v14 }
 0x318   :  { %3218 = vmatprep.subr.bf16.mxu0 %v3614_v0 }
 0x31b   :  { %3220 = vmatpush3.bf16.msra.mxu0 %v3769_v20 }
 0x31c   :  { %3222 = vmatprep.subr.bf16.mxu0 %v3712_v25 }
 0x3e1   :  { %v341_v44 = vpop.f32.mrb[2].mxu0 }
 0x3e2   :  { %v517_v45 = vrot.slane %v341_v44, 7  ;;  %v343_v46 = vpop.f32.mrb[3].mxu0 }
 0x3e4   :  { %v519_v47 = vadd.f32 %v517_v45, %v3704_v12 }
 0x3e6   :  { %3450 = vtanh.f32 %v519_v47 }
 0x3e9   :  { %v415_v49 = vpop.f32.mrb[4].mxu0 }
 0x3ea   :  { %v419_v50 = vadd.f32 %v415_v49, %v343_v46  ;;  %v2927_v51 = vpop.f32.mrb[5].mxu0 }
 0x3ec   :  { %v420_v52 = vadd.f32 %v419_v50, %v3742_v48 }
 0x3ee   :  { %3452 = vtanh.f32 %v420_v52 }
 0x3f0   :  { %v3451_v53 = vpop.eup %3450 }
 0x3f1   :  { %528 = vrot.lane.b32.xlu1 %v3451_v53, %s3617_s3  ;;  %v521_v55 = vmul.f32 0.5, %v3451_v53 }
 0x3f3   :  { %v522_v56 = vadd.f32 0.5, %v521_v55 }
 0x3f5   :  { %v526_v2 = vmul.f32 %v524_v63, %v522_v56 }
 0x3f8   :  { %v3453_v54 = vpop.eup %3452 }
 0x3f9   :  { %426 = vrot.lane.b32.xlu0 %v3453_v54, %s3617_s3  ;;  %v422_v59 = vmul.f32 0.5, %v3453_v54 }
 0x3fb   :  { %v423_v60 = vadd.f32 0.5, %v422_v59 }
 0x3fd   :  { %v424_v5 = vmul.f32 0.0, %v423_v60 }
 0x463   :  { %v529_v57 = vpop.permute.xlu1 %528 }
 0x464   :  { %v531_v58 = vmul.f32 %v529_v57, %v522_v56 }
 0x466   :  { %533 = vrot.lane.b32.xlu1 %v531_v58, %s3618_s11 }
 0x46b   :  { %v427_v61 = vpop.permute.xlu0 %426 }
 0x46c   :  { %v429_v62 = vmul.f32 %v427_v61, %v423_v60 }
 0x46e   :  { %431 = vrot.lane.b32.xlu0 %v429_v62, %s3618_s11 }
 0x4d8   :  { %v534_v3 = vpop.permute.xlu1 %533 }
 0x4d9   :  { %v3750_v4 = vadd.f32 %v534_v3, %v526_v2 }
 0x4db   :  { %3454 = vtanh.f32 %v3750_v4 }
 0x4e0   :  { %v432_v6 = vpop.permute.xlu0 %431 }
 0x4e1   :  { %v3753_v9 = vadd.f32 %v432_v6, %v424_v5 }
 0x4e3   :  { %3456 = vtanh.f32 %v3753_v9 }
 0x4e5   :  { %v3455_v16 = vpop.eup %3454 }
 0x4e6   :  { %539 = vrot.lane.b32.xlu1 %v3455_v16, %s3617_s3 }
 0x4ed   :  { %v3457_v17 = vpop.eup %3456 }
 0x4ee   :  { %437 = vrot.lane.b32.xlu0 %v3457_v17, %s3617_s3 }
 0x558   :  { %v540_v21 = vpop.permute.xlu1 %539 }
 0x559   :  { %v542_v22 = vmul.f32 %v540_v21, %v522_v56 }
 0x55b   :  { %v544_v23 = vrot.slane %v542_v22, 1 }
 0x55d   :  { %545 = vrot.lane.b32.xlu1 %v544_v23, %s3618_s11 }
 0x560   :  { %v438_v24 = vpop.permute.xlu0 %437 }
 0x561   :  { %v440_v26 = vmul.f32 %v438_v24, %v423_v60  ;;  %v798_v60 = vrot.slane %v3750_v4, 7 }
 0x563   :  { %442 = vrot.lane.b32.xlu0 %v440_v26, %s3618_s11 }
 0x5cf   :  { %v546_v32 = vpop.permute.xlu1 %545 }
 0x5d5   :  { %v443_v31 = vpop.permute.xlu0 %442 }
 0x5d6   :  { %2937 = vmatmul.mubr.msk.f32.vlgmr.msra.gmra.mrb[6].mxu0 %vm272_vm2, %v443_v31  ;;  %2948 = vmatmul.mubr.msk.f32.vlgmr.msra.gmra.mrb[2].mxu1 %vm272_vm2, %v443_v31 }
 0x5d7   :  { %3224 = vmatpush1.bf16.msra.mxu0 %v3714_v29  ;;  %613 = vmatprep.mubr.f32.mxu0 %v3616_v1 }
 0x5d8   :  { %3226 = vmatprep.subr.bf16.mxu0 %v3716_v30  ;;  %3244 = vmatpush1.bf16.msra.mxu1 %v3714_v29 }
 0x5d9   :  { %3246 = vmatprep.subr.bf16.mxu1 %v3716_v30  ;;  %887 = vmatprep.mubr.f32.mxu1 %v3616_v1 }
 0x5db   :  { %3228 = vmatpush1.bf16.msra.mxu0 %v3720_v33 }
 0x5dc   :  { %3235 = vmatprep.subr.bf16.mxu0 %v3614_v0  ;;  %3248 = vmatpush1.bf16.msra.mxu1 %v3720_v33 }
 0x5dd   :  { %3255 = vmatprep.subr.bf16.mxu1 %v3614_v0 }
 0x5de   :  { %2748 = vmatmul.mubr.msk.f32.vlgmr.msra.gmra.mrb[8].mxu0 %vm272_vm2, %v546_v32 }
 0x5df   :  { %3237 = vmatpush3.bf16.msra.mxu0 %v3756_v14  ;;  %2958 = vmatprep.mubr.msk.f32.mxu0 %vm3615_vm0, %v3616_v1 }
 0x5e0   :  { %3238 = vmatprep.subr.bf16.mxu0 %v3614_v0 }
 0x5e3   :  { %3240 = vmatpush3.bf16.msra.mxu0 %v3769_v20 }
 0x5e4   :  { %3249 = vmatprep.subr.bf16.mxu0 %v3614_v0 }
 0x6a9   :  { %v512_v37 = vpop.f32.mrb[6].mxu0  ;;  %v686_v38 = vpop.f32.mrb[2].mxu1 }
 0x6aa   :  { %v3799_v40 = vadd.f32 %v512_v37, %v3796_v36  ;;  %v2938_v41 = vpop.f32.mrb[7].mxu0  ;;  %v2949_v42 = vpop.f32.mrb[3].mxu1 }
 0x6b1   :  { %v615_v44 = vpop.f32.mrb[8].mxu0 }
 0x6b2   :  { %v791_v45 = vrot.slane %v615_v44, 6  ;;  %v617_v46 = vpop.f32.mrb[9].mxu0 }
 0x6b3   :  { %v690_v47 = vadd.f32 %v686_v38, %v617_v46 }
 0x6b4   :  { %v793_v49 = vadd.f32 %v791_v45, %v3704_v12 }
 0x6b5   :  { %v691_v50 = vadd.f32 %v690_v47, %v3742_v48 }
 0x6b6   :  { %3458 = vtanh.f32 %v793_v49 }
 0x6b7   :  { %3460 = vtanh.f32 %v691_v50 }
 0x6c0   :  { %v3459_v8 = vpop.eup %3458 }
 0x6c1   :  { %v3461_v51 = vpop.eup %3460  ;;  %802 = vrot.lane.b32.xlu1 %v3459_v8, %s3617_s3  ;;  %v795_v52 = vmul.f32 0.5, %v3459_v8 }
 0x6c2   :  { %697 = vrot.lane.b32.xlu0 %v3461_v51, %s3617_s3  ;;  %v693_v53 = vmul.f32 0.5, %v3461_v51 }
 0x6c3   :  { %v796_v54 = vadd.f32 0.5, %v795_v52 }
 0x6c4   :  { %v694_v56 = vadd.f32 0.5, %v693_v53 }
 0x6c5   :  { %v800_v61 = vmul.f32 %v798_v60, %v796_v54 }
 0x6c6   :  { %v695_v63 = vmul.f32 %v694_v56, %v3753_v9 }
 0x733   :  { %v803_v55 = vpop.permute.xlu1 %802 }
 0x734   :  { %v805_v57 = vmul.f32 %v803_v55, %v796_v54  ;;  %v698_v58 = vpop.permute.xlu0 %697 }
 0x735   :  { %v700_v59 = vmul.f32 %v698_v58, %v694_v56 }
 0x736   :  { %807 = vrot.lane.b32.xlu1 %v805_v57, %s3618_s11 }
 0x737   :  { %702 = vrot.lane.b32.xlu0 %v700_v59, %s3618_s11 }
 0x7a8   :  { %v808_v62 = vpop.permute.xlu1 %807 }
 0x7a9   :  { %v3809_v2 = vadd.f32 %v808_v62, %v800_v61  ;;  %v703_v3 = vpop.permute.xlu0 %702 }
 0x7aa   :  { %v3811_v5 = vadd.f32 %v703_v3, %v695_v63 }
 0x7ab   :  { %3462 = vtanh.f32 %v3809_v2  ;;  %v1071_v8 = vrot.slane %v3809_v2, 7 }
 0x7ac   :  { %3464 = vtanh.f32 %v3811_v5 }
 0x7b5   :  { %v3463_v6 = vpop.eup %3462 }
 0x7b6   :  { %v3465_v10 = vpop.eup %3464  ;;  %813 = vrot.lane.b32.xlu1 %v3463_v6, %s3617_s3 }
 0x7b7   :  { %708 = vrot.lane.b32.xlu0 %v3465_v10, %s3617_s3 }
 0x828   :  { %v814_v4 = vpop.permute.xlu1 %813 }
 0x829   :  { %v816_v11 = vmul.f32 %v814_v4, %v796_v54  ;;  %v709_v13 = vpop.permute.xlu0 %708 }
 0x82a   :  { %v711_v15 = vmul.f32 %v709_v13, %v694_v56 }
 0x82b   :  { %v818_v9 = vrot.slane %v816_v11, 2  ;;  %v989_v11 = vrot.slane %v3796_v36, 2 }
 0x82c   :  { %713 = vrot.lane.b32.xlu0 %v711_v15, %s3618_s11 }
 0x82d   :  { %819 = vrot.lane.b32.xlu1 %v818_v9, %s3618_s11 }
 0x89e   :  { %v714_v16 = vpop.permute.xlu0 %713 }
 0x89f   :  { %v820_v17 = vpop.permute.xlu1 %819  ;;  %2959 = vmatmul.mubr.msk.f32.vlgmr.msra.gmra.mrb[10].mxu0 %vm272_vm2, %v714_v16 }
 0x8a0   :  { %3251 = vmatpush3.bf16.msra.mxu0 %v3727_v39  ;;  %2751 = vmatmul.mubr.msk.f32.vlgmr.msra.gmra.mrb[4].mxu1 %vm272_vm2, %v820_v17 }
 0x8a1   :  { %3252 = vmatprep.subr.bf16.mxu0 %v3614_v0  ;;  %2969 = vmatprep.mubr.msk.f32.mxu0 %vm3615_vm0, %v3616_v1 }
 0x8a2   :  { %3257 = vmatpush3.bf16.msra.mxu1 %v3756_v14  ;;  %2980 = vmatprep.mubr.msk.f32.mxu1 %vm3615_vm0, %v3616_v1 }
 0x8a3   :  { %3258 = vmatprep.subr.bf16.mxu1 %v3614_v0 }
 0x8a4   :  { %3254 = vmatpush3.bf16.msra.mxu0 %v3731_v43 }
 0x8a5   :  { %3262 = vmatprep.subr.bf16.mxu0 %v3712_v25 }
 0x8a6   :  { %3260 = vmatpush3.bf16.msra.mxu1 %v3769_v20 }
 0x8a7   :  { %2970 = vmatmul.mubr.msk.f32.vlgmr.msra.gmra.mrb[12].mxu0 %vm272_vm2, %v714_v16  ;;  %3269 = vmatprep.subr.bf16.mxu1 %v3614_v0 }
 0x8a8   :  { %3264 = vmatpush1.bf16.msra.mxu0 %v3714_v29  ;;  %1160 = vmatprep.mubr.f32.mxu0 %v3616_v1 }
 0x8a9   :  { %3266 = vmatprep.subr.bf16.mxu0 %v3716_v30 }
 0x8ac   :  { %3268 = vmatpush1.bf16.msra.mxu0 %v3720_v33 }
 0x8ad   :  { %3275 = vmatprep.subr.bf16.mxu0 %v3614_v0 }
 0x972   :  { %v786_v19 = vpop.f32.mrb[10].mxu0 }
 0x973   :  { %v787_v21 = vadd.f32 %v786_v19, %v716_v18  ;;  %v2960_v22 = vpop.f32.mrb[11].mxu0  ;;  %v889_v23 = vpop.f32.mrb[4].mxu1 }
 0x974   :  { %v1064_v24 = vrot.slane %v889_v23, 5  ;;  %v891_v26 = vpop.f32.mrb[5].mxu1 }
 0x975   :  { %v2428_v27 = vrot.slane %v787_v21, 7 }
 0x976   :  { %v1066_v28 = vadd.f32 %v1064_v24, %v3704_v12 }
 0x977   :  { %v3842_v31 = vsel %vm2448_vm4, %v3799_v40, %v2428_v27 }
 0x978   :  { %3466 = vtanh.f32 %v1066_v28 }
 0x97a   :  { %v960_v32 = vpop.f32.mrb[12].mxu0 }
 0x97b   :  { %v964_v34 = vadd.f32 %v960_v32, %v891_v26  ;;  %v2971_v35 = vpop.f32.mrb[13].mxu0 }
 0x97d   :  { %v965_v37 = vadd.f32 %v964_v34, %v3742_v48 }
 0x97f   :  { %3468 = vtanh.f32 %v965_v37 }
 0x982   :  { %v3467_v38 = vpop.eup %3466 }
 0x983   :  { %1075 = vrot.lane.b32.xlu1 %v3467_v38, %s3617_s3  ;;  %v1068_v42 = vmul.f32 0.5, %v3467_v38 }
 0x985   :  { %v1069_v44 = vadd.f32 0.5, %v1068_v42 }
 0x987   :  { %v1073_v51 = vmul.f32 %v1071_v8, %v1069_v44 }
 0x989   :  { %v3469_v41 = vpop.eup %3468 }
 0x98a   :  { %971 = vrot.lane.b32.xlu0 %v3469_v41, %s3617_s3  ;;  %v967_v47 = vmul.f32 0.5, %v3469_v41 }
 0x98c   :  { %v968_v40 = vadd.f32 0.5, %v967_v47 }
 0x98e   :  { %v969_v54 = vmul.f32 %v968_v40, %v3811_v5 }
 0x9f5   :  { %v1076_v45 = vpop.permute.xlu1 %1075 }
 0x9f6   :  { %v1078_v46 = vmul.f32 %v1076_v45, %v1069_v44 }
 0x9f8   :  { %1080 = vrot.lane.b32.xlu1 %v1078_v46, %s3618_s11 }
 0x9fc   :  { %v972_v49 = vpop.permute.xlu0 %971 }
 0x9fd   :  { %v974_v50 = vmul.f32 %v972_v49, %v968_v40 }
 0x9ff   :  { %976 = vrot.lane.b32.xlu0 %v974_v50, %s3618_s11 }
 0xa6a   :  { %v1081_v52 = vpop.permute.xlu1 %1080 }
 0xa6b   :  { %v3850_v53 = vadd.f32 %v1081_v52, %v1073_v51 }
 0xa6d   :  { %3470 = vtanh.f32 %v3850_v53  ;;  %v1344_v38 = vrot.slane %v3850_v53, 7 }
 0xa71   :  { %v977_v55 = vpop.permute.xlu0 %976 }
 0xa72   :  { %v3854_v56 = vadd.f32 %v977_v55, %v969_v54 }
 0xa74   :  { %3472 = vtanh.f32 %v3854_v56 }
 0xa77   :  { %v3471_v57 = vpop.eup %3470 }
 0xa78   :  { %1086 = vrot.lane.b32.xlu1 %v3471_v57, %s3617_s3 }
 0xa7e   :  { %v3473_v58 = vpop.eup %3472 }
 0xa7f   :  { %982 = vrot.lane.b32.xlu0 %v3473_v58, %s3617_s3 }
 0xaea   :  { %v1087_v59 = vpop.permute.xlu1 %1086 }
 0xaeb   :  { %v1089_v60 = vmul.f32 %v1087_v59, %v1069_v44 }
 0xaed   :  { %v1091_v61 = vrot.slane %v1089_v60, 3  ;;  %v1262_v60 = vrot.slane %v3796_v36, 3 }
 0xaef   :  { %1092 = vrot.lane.b32.xlu1 %v1091_v61, %s3618_s11 }
 0xaf1   :  { %v983_v62 = vpop.permute.xlu0 %982 }
 0xaf2   :  { %v985_v63 = vmul.f32 %v983_v62, %v968_v40 }
 0xaf4   :  { %987 = vrot.lane.b32.xlu0 %v985_v63, %s3618_s11 }
 0xb61   :  { %v1093_v2 = vpop.permute.xlu1 %1092 }
 0xb62   :  { %2754 = vmatmul.mubr.msk.f32.vlgmr.msra.gmra.mrb[14].mxu0 %vm272_vm2, %v1093_v2 }
 0xb63   :  { %3277 = vmatpush3.bf16.msra.mxu0 %v3756_v14  ;;  %3002 = vmatprep.mubr.msk.f32.mxu0 %vm3615_vm0, %v3616_v1 }
 0xb64   :  { %3278 = vmatprep.subr.bf16.mxu0 %v3614_v0 }
 0xb66   :  { %v988_v3 = vpop.permute.xlu0 %987 }
 0xb67   :  { %2981 = vmatmul.mubr.msk.f32.vlgmr.msra.gmra.mrb[6].mxu1 %vm272_vm2, %v988_v3  ;;  %3280 = vmatpush3.bf16.msra.mxu0 %v3769_v20 }
 0xb68   :  { %3271 = vmatpush3.bf16.msra.mxu1 %v3727_v39  ;;  %2991 = vmatprep.mubr.msk.f32.mxu1 %vm3615_vm0, %v3616_v1 }
 0xb69   :  { %3272 = vmatprep.subr.bf16.mxu1 %v3614_v0  ;;  %3289 = vmatprep.subr.bf16.mxu0 %v3614_v0 }
 0xb6c   :  { %3274 = vmatpush3.bf16.msra.mxu1 %v3731_v43 }
 0xb6d   :  { %3282 = vmatprep.subr.bf16.mxu1 %v3712_v25 }
 0xb6f   :  { %2992 = vmatmul.mubr.msk.f32.vlgmr.msra.gmra.mrb[8].mxu1 %vm272_vm2, %v988_v3 }
 0xb70   :  { %3284 = vmatpush1.bf16.msra.mxu1 %v3714_v29  ;;  %1433 = vmatprep.mubr.f32.mxu1 %v3616_v1 }
 0xb71   :  { %3286 = vmatprep.subr.bf16.mxu1 %v3716_v30 }
 0xb74   :  { %3288 = vmatpush1.bf16.msra.mxu1 %v3720_v33 }
 0xb75   :  { %3295 = vmatprep.subr.bf16.mxu1 %v3614_v0 }
 0xc35   :  { %v1162_v5 = vpop.f32.mrb[14].mxu0 }
 0xc36   :  { %v1337_v6 = vrot.slane %v1162_v5, 4  ;;  %v1164_v10 = vpop.f32.mrb[15].mxu0 }
 0xc38   :  { %v1339_v4 = vadd.f32 %v1337_v6, %v3704_v12 }
 0xc3a   :  { %3474 = vtanh.f32 %v1339_v4  ;;  %v1059_v13 = vpop.f32.mrb[6].mxu1 }
 0xc3b   :  { %v1060_v15 = vadd.f32 %v1059_v13, %v989_v11  ;;  %v2982_v9 = vpop.f32.mrb[7].mxu1 }
 0xc3d   :  { %v2431_v16 = vrot.slane %v1060_v15, 6 }
 0xc3f   :  { %v3884_v17 = vsel %vm2450_vm5, %v3842_v31, %v2431_v16 }
 0xc42   :  { %v1233_v18 = vpop.f32.mrb[8].mxu1 }
 0xc43   :  { %v1237_v19 = vadd.f32 %v1233_v18, %v1164_v10  ;;  %v2993_v21 = vpop.f32.mrb[9].mxu1 }
 0xc44   :  { %v3475_v22 = vpop.eup %3474 }
 0xc45   :  { %v1238_v23 = vadd.f32 %v1237_v19, %v3742_v48  ;;  %1348 = vrot.lane.b32.xlu1 %v3475_v22, %s3617_s3  ;;  %v1341_v26 = vmul.f32 0.5, %v3475_v22 }
 0xc47   :  { %3476 = vtanh.f32 %v1238_v23  ;;  %v1342_v27 = vadd.f32 0.5, %v1341_v26 }
 0xc49   :  { %v1346_v41 = vmul.f32 %v1344_v38, %v1342_v27 }
 0xc51   :  { %v3477_v24 = vpop.eup %3476 }
 0xc52   :  { %1244 = vrot.lane.b32.xlu0 %v3477_v24, %s3617_s3  ;;  %v1240_v31 = vmul.f32 0.5, %v3477_v24 }
 0xc54   :  { %v1241_v34 = vadd.f32 0.5, %v1240_v31 }
 0xc56   :  { %v1242_v45 = vmul.f32 %v1241_v34, %v3854_v56 }
 0xcb7   :  { %v1349_v28 = vpop.permute.xlu1 %1348 }
 0xcb8   :  { %v1351_v32 = vmul.f32 %v1349_v28, %v1342_v27 }
 0xcba   :  { %1353 = vrot.lane.b32.xlu1 %v1351_v32, %s3618_s11 }
 0xcc4   :  { %v1245_v35 = vpop.permute.xlu0 %1244 }
 0xcc5   :  { %v1247_v37 = vmul.f32 %v1245_v35, %v1241_v34 }
 0xcc7   :  { %1249 = vrot.lane.b32.xlu0 %v1247_v37, %s3618_s11 }
 0xd2c   :  { %v1354_v42 = vpop.permute.xlu1 %1353 }
 0xd2d   :  { %v3892_v44 = vadd.f32 %v1354_v42, %v1346_v41 }
 0xd2f   :  { %3478 = vtanh.f32 %v3892_v44  ;;  %v1617_v23 = vrot.slane %v3892_v44, 7 }
 0xd39   :  { %v3479_v46 = vpop.eup %3478  ;;  %v1250_v47 = vpop.permute.xlu0 %1249 }
 0xd3a   :  { %v3896_v40 = vadd.f32 %v1250_v47, %v1242_v45  ;;  %1359 = vrot.lane.b32.xlu1 %v3479_v46, %s3617_s3 }
 0xd3c   :  { %3480 = vtanh.f32 %v3896_v40 }
 0xd46   :  { %v3481_v49 = vpop.eup %3480 }
 0xd47   :  { %1255 = vrot.lane.b32.xlu0 %v3481_v49, %s3617_s3 }
 0xdac   :  { %v1360_v50 = vpop.permute.xlu1 %1359 }
 0xdad   :  { %v1362_v8 = vmul.f32 %v1360_v50, %v1342_v27 }
 0xdaf   :  { %v1364_v51 = vrot.slane %v1362_v8, 4 }
 0xdb1   :  { %1365 = vrot.lane.b32.xlu1 %v1364_v51, %s3618_s11  ;;  %v1535_v51 = vrot.slane %v3796_v36, 4 }
 0xdb9   :  { %v1256_v52 = vpop.permute.xlu0 %1255 }
 0xdba   :  { %v1258_v53 = vmul.f32 %v1256_v52, %v1241_v34 }
 0xdbc   :  { %1260 = vrot.lane.b32.xlu0 %v1258_v53, %s3618_s11 }
 0xe23   :  { %v1366_v54 = vpop.permute.xlu1 %1365 }
 0xe24   :  { %2757 = vmatmul.mubr.msk.f32.vlgmr.msra.gmra.mrb[10].mxu1 %vm272_vm2, %v1366_v54 }
 0xe25   :  { %3297 = vmatpush3.bf16.msra.mxu1 %v3756_v14  ;;  %3024 = vmatprep.mubr.msk.f32.mxu1 %vm3615_vm0, %v3616_v1 }
 0xe26   :  { %3298 = vmatprep.subr.bf16.mxu1 %v3614_v0 }
 0xe29   :  { %3300 = vmatpush3.bf16.msra.mxu1 %v3769_v20 }
 0xe2a   :  { %3309 = vmatprep.subr.bf16.mxu1 %v3614_v0 }
 0xe2e   :  { %v1261_v55 = vpop.permute.xlu0 %1260 }
 0xe2f   :  { %3003 = vmatmul.mubr.msk.f32.vlgmr.msra.gmra.mrb[16].mxu0 %vm272_vm2, %v1261_v55 }
 0xe30   :  { %3291 = vmatpush3.bf16.msra.mxu0 %v3727_v39  ;;  %3013 = vmatprep.mubr.msk.f32.mxu0 %vm3615_vm0, %v3616_v1 }
 0xe31   :  { %3292 = vmatprep.subr.bf16.mxu0 %v3614_v0 }
 0xe34   :  { %3294 = vmatpush3.bf16.msra.mxu0 %v3731_v43 }
 0xe35   :  { %3302 = vmatprep.subr.bf16.mxu0 %v3712_v25 }
 0xe37   :  { %3014 = vmatmul.mubr.msk.f32.vlgmr.msra.gmra.mrb[18].mxu0 %vm272_vm2, %v1261_v55 }
 0xe38   :  { %3304 = vmatpush1.bf16.msra.mxu0 %v3714_v29  ;;  %1706 = vmatprep.mubr.f32.mxu0 %v3616_v1 }
 0xe39   :  { %3306 = vmatprep.subr.bf16.mxu0 %v3716_v30 }
 0xe3c   :  { %3308 = vmatpush1.bf16.msra.mxu0 %v3720_v33 }
 0xe3d   :  { %3315 = vmatprep.subr.bf16.mxu0 %v3614_v0 }
 0xef7   :  { %v1435_v56 = vpop.f32.mrb[10].mxu1 }
 0xef8   :  { %v1610_v57 = vrot.slane %v1435_v56, 3  ;;  %v1437_v58 = vpop.f32.mrb[11].mxu1 }
 0xefa   :  { %v1612_v59 = vadd.f32 %v1610_v57, %v3704_v12 }
 0xefc   :  { %3482 = vtanh.f32 %v1612_v59 }
 0xf02   :  { %v1332_v61 = vpop.f32.mrb[16].mxu0 }
 0xf03   :  { %v1333_v62 = vadd.f32 %v1332_v61, %v1262_v60  ;;  %v3004_v63 = vpop.f32.mrb[17].mxu0 }
 0xf05   :  { %v2434_v2 = vrot.slane %v1333_v62, 5 }
 0xf06   :  { %v3483_v3 = vpop.eup %3482 }
 0xf07   :  { %v3926_v5 = vsel %vm2452_vm6, %v3884_v17, %v2434_v2  ;;  %1621 = vrot.lane.b32.xlu1 %v3483_v3, %s3617_s3  ;;  %v1614_v15 = vmul.f32 0.5, %v3483_v3 }
 0xf09   :  { %v1615_v9 = vadd.f32 0.5, %v1614_v15 }
 0xf0a   :  { %v1506_v6 = vpop.f32.mrb[18].mxu0 }
 0xf0b   :  { %v1510_v10 = vadd.f32 %v1506_v6, %v1437_v58  ;;  %v3015_v4 = vpop.f32.mrb[19].mxu0  ;;  %v1619_v24 = vmul.f32 %v1617_v23, %v1615_v9 }
 0xf0d   :  { %v1511_v11 = vadd.f32 %v1510_v10, %v3742_v48 }
 0xf0f   :  { %3484 = vtanh.f32 %v1511_v11 }
 0xf19   :  { %v3485_v13 = vpop.eup %3484 }
 0xf1a   :  { %1517 = vrot.lane.b32.xlu0 %v3485_v13, %s3617_s3  ;;  %v1513_v19 = vmul.f32 0.5, %v3485_v13 }
 0xf1c   :  { %v1514_v17 = vadd.f32 0.5, %v1513_v19 }
 0xf1e   :  { %v1515_v32 = vmul.f32 %v1514_v17, %v3896_v40 }
 0xf79   :  { %v1622_v16 = vpop.permute.xlu1 %1621 }
 0xf7a   :  { %v1624_v18 = vmul.f32 %v1622_v16, %v1615_v9 }
 0xf7c   :  { %1626 = vrot.lane.b32.xlu1 %v1624_v18, %s3618_s11 }
 0xf8c   :  { %v1518_v21 = vpop.permute.xlu0 %1517 }
 0xf8d   :  { %v1520_v22 = vmul.f32 %v1518_v21, %v1514_v17 }
 0xf8f   :  { %1522 = vrot.lane.b32.xlu0 %v1520_v22, %s3618_s11 }
 0xfee   :  { %v1627_v26 = vpop.permute.xlu1 %1626 }
 0xfef   :  { %v3934_v27 = vadd.f32 %v1627_v26, %v1619_v24 }
 0xff1   :  { %3486 = vtanh.f32 %v3934_v27  ;;  %v1890_v11 = vrot.slane %v3934_v27, 7 }
 0xffb   :  { %v3487_v28 = vpop.eup %3486 }
 0xffc   :  { %1632 = vrot.lane.b32.xlu1 %v3487_v28, %s3617_s3 }
0x1001   :  { %v1523_v31 = vpop.permute.xlu0 %1522 }
0x1002   :  { %v3939_v34 = vadd.f32 %v1523_v31, %v1515_v32 }
0x1004   :  { %3488 = vtanh.f32 %v3939_v34 }
0x100e   :  { %v3489_v35 = vpop.eup %3488 }
0x100f   :  { %1528 = vrot.lane.b32.xlu0 %v3489_v35, %s3617_s3 }
0x106e   :  { %v1633_v37 = vpop.permute.xlu1 %1632 }
0x106f   :  { %v1635_v38 = vmul.f32 %v1633_v37, %v1615_v9 }
0x1071   :  { %v1637_v41 = vrot.slane %v1635_v38, 5 }
0x1073   :  { %1638 = vrot.lane.b32.xlu1 %v1637_v41, %s3618_s11 }
0x1081   :  { %v1529_v42 = vpop.permute.xlu0 %1528 }
0x1082   :  { %v1531_v44 = vmul.f32 %v1529_v42, %v1514_v17 }
0x1084   :  { %1533 = vrot.lane.b32.xlu0 %v1531_v44, %s3618_s11 }
0x10e5   :  { %v1639_v45 = vpop.permute.xlu1 %1638 }
0x10e6   :  { %2760 = vmatmul.mubr.msk.f32.vlgmr.msra.gmra.mrb[20].mxu0 %vm272_vm2, %v1639_v45 }
0x10e7   :  { %3317 = vmatpush3.bf16.msra.mxu0 %v3756_v14  ;;  %3046 = vmatprep.mubr.msk.f32.mxu0 %vm3615_vm0, %v3616_v1 }
0x10e8   :  { %3318 = vmatprep.subr.bf16.mxu0 %v3614_v0 }
0x10eb   :  { %3320 = vmatpush3.bf16.msra.mxu0 %v3769_v20 }
0x10ec   :  { %3329 = vmatprep.subr.bf16.mxu0 %v3614_v0 }
0x10f6   :  { %v1534_v46 = vpop.permute.xlu0 %1533 }
0x10f7   :  { %3025 = vmatmul.mubr.msk.f32.vlgmr.msra.gmra.mrb[12].mxu1 %vm272_vm2, %v1534_v46 }
0x10f8   :  { %3311 = vmatpush3.bf16.msra.mxu1 %v3727_v39  ;;  %3035 = vmatprep.mubr.msk.f32.mxu1 %vm3615_vm0, %v3616_v1 }
0x10f9   :  { %3312 = vmatprep.subr.bf16.mxu1 %v3614_v0 }
0x10fc   :  { %3314 = vmatpush3.bf16.msra.mxu1 %v3731_v43 }
0x10fd   :  { %3322 = vmatprep.subr.bf16.mxu1 %v3712_v25 }
0x10ff   :  { %3036 = vmatmul.mubr.msk.f32.vlgmr.msra.gmra.mrb[14].mxu1 %vm272_vm2, %v1534_v46 }
0x1100   :  { %3324 = vmatpush1.bf16.msra.mxu1 %v3714_v29  ;;  %1979 = vmatprep.mubr.f32.mxu1 %v3616_v1 }
0x1101   :  { %3326 = vmatprep.subr.bf16.mxu1 %v3716_v30 }
0x1104   :  { %3328 = vmatpush1.bf16.msra.mxu1 %v3720_v33 }
0x1105   :  { %3335 = vmatprep.subr.bf16.mxu1 %v3614_v0 }
0x11b9   :  { %v1708_v47 = vpop.f32.mrb[20].mxu0 }
0x11ba   :  { %v1883_v40 = vrot.slane %v1708_v47, 2  ;;  %v1710_v49 = vpop.f32.mrb[21].mxu0 }
0x11bc   :  { %v1885_v50 = vadd.f32 %v1883_v40, %v3704_v12 }
0x11be   :  { %3490 = vtanh.f32 %v1885_v50 }
0x11c8   :  { %v3491_v8 = vpop.eup %3490 }
0x11c9   :  { %1894 = vrot.lane.b32.xlu1 %v3491_v8, %s3617_s3  ;;  %v1887_v62 = vmul.f32 0.5, %v3491_v8 }
0x11ca   :  { %v1605_v52 = vpop.f32.mrb[12].mxu1 }
0x11cb   :  { %v1606_v53 = vadd.f32 %v1605_v52, %v1535_v51  ;;  %v3026_v54 = vpop.f32.mrb[13].mxu1  ;;  %v1888_v63 = vadd.f32 0.5, %v1887_v62 }
0x11cd   :  { %v2437_v55 = vrot.slane %v1606_v53, 4  ;;  %v1892_v13 = vmul.f32 %v1890_v11, %v1888_v63  ;;  %v2081_v11 = vrot.slane %v3796_v36, 6 }
0x11cf   :  { %v3969_v56 = vsel %vm2454_vm7, %v3926_v5, %v2437_v55 }
0x11d2   :  { %v1779_v57 = vpop.f32.mrb[14].mxu1 }
0x11d3   :  { %v1783_v58 = vadd.f32 %v1779_v57, %v1710_v49  ;;  %v3037_v59 = vpop.f32.mrb[15].mxu1 }
0x11d5   :  { %v1784_v60 = vadd.f32 %v1783_v58, %v3742_v48 }
0x11d7   :  { %3492 = vtanh.f32 %v1784_v60 }
0x11e1   :  { %v3493_v61 = vpop.eup %3492 }
0x11e2   :  { %1790 = vrot.lane.b32.xlu0 %v3493_v61, %s3617_s3  ;;  %v1786_v6 = vmul.f32 0.5, %v3493_v61 }
0x11e4   :  { %v1787_v10 = vadd.f32 0.5, %v1786_v6 }
0x11e6   :  { %v1788_v18 = vmul.f32 %v1787_v10, %v3939_v34 }
0x123b   :  { %v1895_v2 = vpop.permute.xlu1 %1894 }
0x123c   :  { %v1897_v3 = vmul.f32 %v1895_v2, %v1888_v63 }
0x123e   :  { %1899 = vrot.lane.b32.xlu1 %v1897_v3, %s3618_s11 }
0x1254   :  { %v1791_v4 = vpop.permute.xlu0 %1790 }
0x1255   :  { %v1793_v5 = vmul.f32 %v1791_v4, %v1787_v10 }
0x1257   :  { %1795 = vrot.lane.b32.xlu0 %v1793_v5, %s3618_s11 }
0x12b0   :  { %v1900_v15 = vpop.permute.xlu1 %1899 }
0x12b1   :  { %v3976_v9 = vadd.f32 %v1900_v15, %v1892_v13 }
0x12b3   :  { %3494 = vtanh.f32 %v3976_v9  ;;  %v2163_v55 = vrot.slane %v3976_v9, 7 }
0x12bd   :  { %v3495_v16 = vpop.eup %3494 }
0x12be   :  { %1905 = vrot.lane.b32.xlu1 %v3495_v16, %s3617_s3 }
0x12c9   :  { %v1796_v19 = vpop.permute.xlu0 %1795 }
0x12ca   :  { %v3981_v17 = vadd.f32 %v1796_v19, %v1788_v18 }
0x12cc   :  { %3496 = vtanh.f32 %v3981_v17 }
0x12d6   :  { %v3497_v21 = vpop.eup %3496 }
0x12d7   :  { %1801 = vrot.lane.b32.xlu0 %v3497_v21, %s3617_s3 }
0x1330   :  { %v1906_v22 = vpop.permute.xlu1 %1905 }
0x1331   :  { %v1908_v23 = vmul.f32 %v1906_v22, %v1888_v63 }
0x1333   :  { %v1910_v24 = vrot.slane %v1908_v23, 6 }
0x1335   :  { %1911 = vrot.lane.b32.xlu1 %v1910_v24, %s3618_s11 }
0x1349   :  { %v1802_v26 = vpop.permute.xlu0 %1801 }
0x134a   :  { %v1804_v27 = vmul.f32 %v1802_v26, %v1787_v10 }
0x134c   :  { %1806 = vrot.lane.b32.xlu0 %v1804_v27, %s3618_s11 }
0x13a7   :  { %v1912_v28 = vpop.permute.xlu1 %1911 }
0x13a8   :  { %2763 = vmatmul.mubr.msk.f32.vlgmr.msra.gmra.mrb[16].mxu1 %vm272_vm2, %v1912_v28 }
0x13a9   :  { %3337 = vmatpush3.bf16.msra.mxu1 %v3756_v14  ;;  %3068 = vmatprep.mubr.msk.f32.mxu1 %vm3615_vm0, %v3616_v1 }
0x13aa   :  { %3338 = vmatprep.subr.bf16.mxu1 %v3614_v0 }
0x13ad   :  { %3340 = vmatpush3.bf16.msra.mxu1 %v3769_v20 }
0x13ae   :  { %3349 = vmatprep.subr.bf16.mxu1 %v3614_v0 }
0x13be   :  { %v1807_v32 = vpop.permute.xlu0 %1806 }
0x13bf   :  { %3047 = vmatmul.mubr.msk.f32.vlgmr.msra.gmra.mrb[22].mxu0 %vm272_vm2, %v1807_v32 }
0x13c0   :  { %3331 = vmatpush3.bf16.msra.mxu0 %v3727_v39  ;;  %3057 = vmatprep.mubr.msk.f32.mxu0 %vm3615_vm0, %v3616_v1 }
0x13c1   :  { %3332 = vmatprep.subr.bf16.mxu0 %v3614_v0 }
0x13c4   :  { %3334 = vmatpush3.bf16.msra.mxu0 %v3731_v43 }
0x13c5   :  { %3342 = vmatprep.subr.bf16.mxu0 %v3712_v25  ;;  %v1808_v25 = vrot.slane %v3796_v36, 5 }
0x13c7   :  { %3058 = vmatmul.mubr.msk.f32.vlgmr.msra.gmra.mrb[24].mxu0 %vm272_vm2, %v1807_v32 }
0x13c8   :  { %3344 = vmatpush1.bf16.msra.mxu0 %v3714_v29  ;;  %2252 = vmatprep.mubr.f32.mxu0 %v3616_v1 }
0x13c9   :  { %3346 = vmatprep.subr.bf16.mxu0 %v3716_v30 }
0x13cc   :  { %3348 = vmatpush1.bf16.msra.mxu0 %v3720_v33 }
0x13cd   :  { %3355 = vmatprep.subr.bf16.mxu0 %v3614_v0 }
0x147b   :  { %v1981_v31 = vpop.f32.mrb[16].mxu1 }
0x147c   :  { %v2156_v34 = vrot.slane %v1981_v31, 1  ;;  %v1983_v35 = vpop.f32.mrb[17].mxu1 }
0x147e   :  { %v2158_v37 = vadd.f32 %v2156_v34, %v3704_v12 }
0x1480   :  { %3498 = vtanh.f32 %v2158_v37  ;;  %v2464_v37 = vld [vmem:[#allocation7 + $0x30] sm:$0xff] }
0x148a   :  { %v3499_v38 = vpop.eup %3498 }
0x148b   :  { %2167 = vrot.lane.b32.xlu1 %v3499_v38, %s3617_s3  ;;  %v2160_v40 = vmul.f32 0.5, %v3499_v38  ;;  %v2465_v38 = vld [vmem:[#allocation7 + $0x38] sm:$0xff] }
0x148d   :  { %v2161_v49 = vadd.f32 0.5, %v2160_v40  ;;  %v2471_v40 = vld [vmem:[#allocation7 + $0x68] sm:$0xff] }
0x1492   :  { %v1878_v29 = vpop.f32.mrb[22].mxu0 }
0x1493   :  { %v1879_v41 = vadd.f32 %v1878_v29, %v1808_v25  ;;  %v3048_v42 = vpop.f32.mrb[23].mxu0  ;;  %v2466_v29 = vld [vmem:[#allocation7 + $0x40] sm:$0xff] }
0x1494   :  { %v2467_v42 = vld [vmem:[#allocation7 + $0x48] sm:$0xff] }
0x1495   :  { %v2440_v30 = vrot.slane %v1879_v41, 3  ;;  %v3365_v41 = vpack.c.bf16 %v2466_v29, %v2465_v38  ;;  %v2648_v38 = vld [vmem:[#allocation7 + $0x140] sm:$0xff]  ;;  %v2649_v29 = vld [vmem:[#allocation7 + $0x148] sm:$0xff] }
0x1497   :  { %v4011_v33 = vsel %vm2456_vm8, %v3969_v56, %v2440_v30  ;;  %v2165_v56 = vmul.f32 %v2163_v55, %v2161_v49  ;;  %v2468_v30 = vld [vmem:[#allocation7 + $0x50] sm:$0xff] }
0x1498   :  { %v2476_v55 = vld [vmem:[#allocation7 + $0x90] sm:$0xff] }
0x149a   :  { %v2052_v44 = vpop.f32.mrb[24].mxu0 }
0x149b   :  { %v2056_v45 = vadd.f32 %v2052_v44, %v1983_v35  ;;  %v3059_v46 = vpop.f32.mrb[25].mxu0  ;;  %v2463_v35 = vld [vmem:[#allocation7 + $0x28] sm:$0xff]  ;;  %v2469_v44 = vld [vmem:[#allocation7 + $0x58] sm:$0xff] }
0x149c   :  { %v3362_v25 = vpack.c.bf16 %v2464_v37, %v2463_v35  ;;  %v2646_v35 = vld [vmem:[#allocation7 + $0x130] sm:$0xff]  ;;  %v2647_v37 = vld [vmem:[#allocation7 + $0x138] sm:$0xff] }
0x149d   :  { %v2057_v47 = vadd.f32 %v2056_v45, %v3742_v48  ;;  %v2470_v45 = vld [vmem:[#allocation7 + $0x60] sm:$0xff] }
0x149f   :  { %3500 = vtanh.f32 %v2057_v47 }
0x14a9   :  { %v3501_v12 = vpop.eup %3500 }
0x14aa   :  { %2063 = vrot.lane.b32.xlu0 %v3501_v12, %s3617_s3  ;;  %v2059_v51 = vmul.f32 0.5, %v3501_v12  ;;  %v3371_v12 = vpack.c.bf16 %v2470_v45, %v2469_v44  ;;  %v2654_v44 = vld [vmem:[#allocation7 + $0x170] sm:$0xff] }
0x14ac   :  { %v2060_v52 = vadd.f32 0.5, %v2059_v51  ;;  %v2474_v51 = vld [vmem:[#allocation7 + $0x80] sm:$0xff] }
0x14ae   :  { %v2061_v59 = vmul.f32 %v2060_v52, %v3981_v17  ;;  %v3510_v17 = vld [vmem:[#allocation6 + $0xa8] sm:$0xff] }
0x14fd   :  { %v2168_v50 = vpop.permute.xlu1 %2167 }
0x14fe   :  { %v2170_v8 = vmul.f32 %v2168_v50, %v2161_v49 }
0x1500   :  { %2172 = vrot.lane.b32.xlu1 %v2170_v8, %s3618_s11  ;;  %v2473_v8 = vld [vmem:[#allocation7 + $0x78] sm:$0xff] }
0x151c   :  { %v2064_v53 = vpop.permute.xlu0 %2063 }
0x151d   :  { %v2066_v54 = vmul.f32 %v2064_v53, %v2060_v52 }
0x151f   :  { %2068 = vrot.lane.b32.xlu0 %v2066_v54, %s3618_s11  ;;  %v2475_v54 = vld [vmem:[#allocation7 + $0x88] sm:$0xff] }
0x1572   :  { %v2173_v48 = vpop.permute.xlu1 %2172 }
0x1573   :  { %v2175_v57 = vadd.f32 %v2173_v48, %v2165_v56  ;;  %v3380_v56 = vpack.c.bf16 %v2476_v55, %v2475_v54  ;;  %v2477_v48 = vld [vmem:[#allocation7 + $0x98] sm:$0xff] }
0x1575   :  { %3502 = vtanh.f32 %v2175_v57  ;;  %v2478_v57 = vld [vmem:[#allocation7 + $0xa0] sm:$0xff] }
0x157f   :  { %v3503_v58 = vpop.eup %3502 }
0x1580   :  { %2178 = vrot.lane.b32.xlu1 %v3503_v58, %s3617_s3  ;;  %v3383_v58 = vpack.c.bf16 %v2478_v57, %v2477_v48  ;;  %v2659_v48 = vld [vmem:[#allocation7 + $0x198] sm:$0xff]  ;;  %v2660_v57 = vld [vmem:[#allocation7 + $0x1a0] sm:$0xff] }
0x1591   :  { %v2069_v60 = vpop.permute.xlu0 %2068 }
0x1592   :  { %v2071_v61 = vadd.f32 %v2069_v60, %v2061_v59  ;;  %v2554_v59 = vld [vmem:[#allocation7 + $0xa8] sm:$0xff]  ;;  %v2555_v60 = vld [vmem:[#allocation7 + $0xb0] sm:$0xff] }
0x1594   :  { %3504 = vtanh.f32 %v2071_v61 }
0x159e   :  { %v3505_v62 = vpop.eup %3504 }
0x159f   :  { %2074 = vrot.lane.b32.xlu0 %v3505_v62, %s3617_s3  ;;  %v3386_v62 = vpack.c.bf16 %v2555_v60, %v2554_v59  ;;  %v2572_v59 = vsub.s32 2, %v3699_v7 }
0x15f2   :  { %v2179_v63 = vpop.permute.xlu1 %2178 }
0x15f3   :  { %v2181_v2 = vmul.f32 %v2179_v63, %v2161_v49  ;;  %v2472_v49 = vld [vmem:[#allocation7 + $0x70] sm:$0xff]  ;;  %v2557_v63 = vld [vmem:[#allocation7 + $0xc0] sm:$0xff] }
0x15f4   :  { %v3374_v50 = vpack.c.bf16 %v2472_v49, %v2471_v40  ;;  %v2657_v40 = vld [vmem:[#allocation7 + $0x188] sm:$0xff]  ;;  %v2658_v49 = vld [vmem:[#allocation7 + $0x190] sm:$0xff] }
0x15f5   :  { %v2183_v3 = vrot.slane %v2181_v2, 7 }
0x15f7   :  { %2184 = vrot.lane.b32.xlu1 %v2183_v3, %s3618_s11  ;;  %v2558_v3 = vld [vmem:[#allocation7 + $0xc8] sm:$0xff] }
0x1611   :  { %v2075_v6 = vpop.permute.xlu0 %2074 }
0x1612   :  { %v2077_v10 = vmul.f32 %v2075_v6, %v2060_v52  ;;  %v3377_v52 = vpack.c.bf16 %v2474_v51, %v2473_v8  ;;  %v2559_v6 = vld [vmem:[#allocation7 + $0xd0] sm:$0xff]  ;;  %v2481_v8 = vsub.s32 1, %v3699_v7  ;;  %v3511_v51 = vld [vmem:[#allocation7 + $0x1a8] sm:$0xff] }
0x1613   :  { %v2573_v60 = vrot.slane %v3511_v51, %v2572_v59 }
0x1614   :  { %2079 = vrot.lane.b32.xlu0 %v2077_v10, %s3618_s11  ;;  %v3392_v10 = vpack.c.bf16 %v2559_v6, %v2558_v3 }
0x1669   :  { %v2185_v4 = vpop.permute.xlu1 %2184 }
0x166a   :  { %2766 = vmatmul.mubr.msk.f32.vlgmr.msra.gmra.mrb[26].mxu0 %vm272_vm2, %v2185_v4  ;;  %v2560_v4 = vld [vmem:[#allocation7 + $0xd8] sm:$0xff] }
0x166b   :  { %3357 = vmatpush3.bf16.msra.mxu0 %v3756_v14  ;;  %3090 = vmatprep.mubr.msk.f32.mxu0 %vm3615_vm0, %v3616_v1 }
0x166c   :  { %3358 = vmatprep.subr.bf16.mxu0 %v3614_v0 }
0x166f   :  { %3360 = vmatpush3.bf16.msra.mxu0 %v3769_v20 }
0x1670   :  { %3385 = vmatprep.subr.bf16.mxu0 %v3614_v0 }
0x1686   :  { %v2080_v5 = vpop.permute.xlu0 %2079 }
0x1687   :  { %3069 = vmatmul.mubr.msk.f32.vlgmr.msra.gmra.mrb[18].mxu1 %vm272_vm2, %v2080_v5 }
0x1688   :  { %3351 = vmatpush3.bf16.msra.mxu1 %v3727_v39  ;;  %3079 = vmatprep.mubr.msk.f32.mxu1 %vm3615_vm0, %v3616_v1 }
0x1689   :  { %3352 = vmatprep.subr.bf16.mxu1 %v3614_v0 }
0x168c   :  { %3354 = vmatpush3.bf16.msra.mxu1 %v3731_v43 }
0x168d   :  { %3361 = vmatprep.subr.bf16.mxu1 %v3614_v0 }
0x168f   :  { %3080 = vmatmul.mubr.msk.f32.vlgmr.msra.gmra.mrb[20].mxu1 %vm272_vm2, %v2080_v5  ;;  %v2561_v5 = vld [vmem:[#allocation7 + $0xe0] sm:$0xff] }
0x1690   :  { %3125 = vmatprep.mubr.msk.f32.mxu1 %vm3615_vm0, %v3616_v1  ;;  %3363 = vmatpush3.bf16.msra.mxu1 %v3362_v25  ;;  %v3413_v25 = vpack.c.bf16 %v2648_v38, %v2647_v37 }
0x1691   :  { %3364 = vmatprep.subr.bf16.mxu1 %v3614_v0 }
0x1694   :  { %3366 = vmatpush3.bf16.msra.mxu1 %v3365_v41 }
0x1695   :  { %3367 = vmatprep.subr.bf16.mxu1 %v3614_v0 }
0x173d   :  { %v2254_v14 = vpop.f32.mrb[26].mxu0 }
0x173e   :  { %v2255_v20 = vpop.f32.mrb[27].mxu0  ;;  %v3395_v14 = vpack.c.bf16 %v2561_v5, %v2560_v4 }
0x175a   :  { %v2151_v13 = vpop.f32.mrb[18].mxu1 }
0x175b   :  { %v2152_v39 = vadd.f32 %v2151_v13, %v2081_v11  ;;  %v3070_v15 = vpop.f32.mrb[19].mxu1  ;;  %v2563_v11 = vld [vmem:[#allocation7 + $0xf0] sm:$0xff] }
0x175c   :  { %v2565_v15 = vld [vmem:[#allocation7 + $0x100] sm:$0xff] }
0x175d   :  { %v2443_v9 = vrot.slane %v2152_v39, 2  ;;  %v2564_v39 = vld [vmem:[#allocation7 + $0xf8] sm:$0xff] }
0x175f   :  { %v4042_v16 = vsel %vm2458_vm9, %v4011_v33, %v2443_v9  ;;  %v3368_v33 = vpack.c.bf16 %v2468_v30, %v2467_v42  ;;  %v3401_v9 = vpack.c.bf16 %v2565_v15, %v2564_v39  ;;  %v2652_v42 = vld [vmem:[#allocation7 + $0x160] sm:$0xff] }
0x1761   :  { %3369 = vmatpush3.bf16.msra.mxu1 %v3368_v33  ;;  %v2653_v33 = vld [vmem:[#allocation7 + $0x168] sm:$0xff] }
0x1762   :  { %v2324_v43 = vpop.f32.mrb[20].mxu1  ;;  %3370 = vmatprep.subr.bf16.mxu1 %v3614_v0  ;;  %v3422_v45 = vpack.c.bf16 %v2654_v44, %v2653_v33 }
0x1763   :  { %v2328_v18 = vadd.f32 %v2324_v43, %v2255_v20  ;;  %v3081_v19 = vpop.f32.mrb[21].mxu1  ;;  %v2562_v20 = vld [vmem:[#allocation7 + $0xe8] sm:$0xff] }
0x1764   :  { %v3398_v13 = vpack.c.bf16 %v2563_v11, %v2562_v20  ;;  %v2566_v43 = vld [vmem:[#allocation7 + $0x108] sm:$0xff] }
0x1765   :  { %v2329_v21 = vadd.f32 %v3510_v17, %v2328_v18  ;;  %3372 = vmatpush3.bf16.msra.mxu1 %v3371_v12  ;;  %v2567_v18 = vld [vmem:[#allocation7 + $0x110] sm:$0xff]  ;;  %v2353_v17 = vrot.slane %v3796_v36, 7 }
0x1766   :  { %3373 = vmatprep.subr.bf16.mxu1 %v3614_v0  ;;  %v3404_v19 = vpack.c.bf16 %v2567_v18, %v2566_v43 }
0x1767   :  { %3506 = vtanh.f32 %v2329_v21 }
0x1769   :  { %3375 = vmatpush3.bf16.msra.mxu1 %v3374_v50  ;;  %v3428_v50 = vpack.c.bf16 %v2658_v49, %v2657_v40 }
0x176a   :  { %3376 = vmatprep.subr.bf16.mxu1 %v3614_v0 }
0x176d   :  { %3378 = vmatpush3.bf16.msra.mxu1 %v3377_v52  ;;  %v2482_v52 = vrot.slane %v3511_v51, %v2481_v8 }
0x176e   :  { %3379 = vmatprep.subr.bf16.mxu1 %v3614_v0 }
0x1771   :  { %v3507_v22 = vpop.eup %3506  ;;  %3381 = vmatpush3.bf16.msra.mxu1 %v3380_v56 }
0x1772   :  { %2335 = vrot.lane.b32.xlu0 %v3507_v22, %s3617_s3  ;;  %v2331_v23 = vmul.f32 0.5, %v3507_v22  ;;  %3382 = vmatprep.subr.bf16.mxu1 %v3614_v0 }
0x1774   :  { %v2332_v24 = vadd.f32 0.5, %v2331_v23 }
0x1775   :  { %3384 = vmatpush3.bf16.msra.mxu1 %v3383_v58  ;;  %v3431_v58 = vpack.c.bf16 %v2660_v57, %v2659_v48 }
0x1776   :  { %v2333_v28 = vmul.f32 %v2332_v24, %v2071_v61  ;;  %3409 = vmatprep.subr.bf16.mxu1 %v3614_v0  ;;  %v2556_v61 = vld [vmem:[#allocation7 + $0xb8] sm:$0xff] }
0x1777   :  { %v3389_v2 = vpack.c.bf16 %v2557_v63, %v2556_v61 }
0x17e4   :  { %v2336_v26 = vpop.permute.xlu0 %2335 }
0x17e5   :  { %v2338_v27 = vmul.f32 %v2336_v26, %v2332_v24 }
0x17e7   :  { %2340 = vrot.lane.b32.xlu1 %v2338_v27, %s3618_s11 }
0x1859   :  { %v2341_v32 = vpop.permute.xlu1 %2340 }
0x185a   :  { %v2343_v31 = vadd.f32 %v2341_v32, %v2333_v28  ;;  %v2568_v28 = vld [vmem:[#allocation7 + $0x118] sm:$0xff]  ;;  %v2569_v32 = vld [vmem:[#allocation7 + $0x120] sm:$0xff] }
0x185c   :  { %3508 = vtanh.f32 %v2343_v31  ;;  %v3407_v31 = vpack.c.bf16 %v2569_v32, %v2568_v28 }
0x1866   :  { %v3509_v34 = vpop.eup %3508 }
0x1867   :  { %2346 = vrot.lane.b32.xlu0 %v3509_v34, %s3617_s3  ;;  %v2645_v34 = vld [vmem:[#allocation7 + $0x128] sm:$0xff] }
0x1868   :  { %v3410_v36 = vpack.c.bf16 %v2646_v35, %v2645_v34 }
0x18d9   :  { %v2347_v46 = vpop.permute.xlu0 %2346 }
0x18da   :  { %v2349_v47 = vmul.f32 %v2347_v46, %v2332_v24  ;;  %v2655_v46 = vld [vmem:[#allocation7 + $0x178] sm:$0xff] }
0x18dc   :  { %2351 = vrot.lane.b32.xlu1 %v2349_v47, %s3618_s11  ;;  %v2656_v47 = vld [vmem:[#allocation7 + $0x180] sm:$0xff] }
0x18dd   :  { %v3425_v12 = vpack.c.bf16 %v2656_v47, %v2655_v46 }
0x194e   :  { %v2352_v53 = vpop.permute.xlu1 %2351 }
0x194f   :  { %3091 = vmatmul.mubr.msk.f32.vlgmr.msra.gmra.mrb[28].mxu0 %vm272_vm2, %v2352_v53 }
0x1950   :  { %3160 = vmatprep.mubr.msk.f32.mxu0 %vm3615_vm0, %v3616_v1  ;;  %3387 = vmatpush3.bf16.msra.mxu0 %v3386_v62 }
0x1951   :  { %3388 = vmatprep.subr.bf16.mxu0 %v3614_v0 }
0x1954   :  { %3390 = vmatpush3.bf16.msra.mxu0 %v3389_v2  ;;  %v2663_v2 = vsub.s32 3, %v3699_v7 }
0x1955   :  { %3391 = vmatprep.subr.bf16.mxu0 %v3614_v0 }
0x1956   :  { %v2664_v3 = vrot.slane %v3511_v51, %v2663_v2 }
0x1958   :  { %3393 = vmatpush3.bf16.msra.mxu0 %v3392_v10 }
0x1959   :  { %3394 = vmatprep.subr.bf16.mxu0 %v3614_v0 }
0x195c   :  { %3396 = vmatpush3.bf16.msra.mxu0 %v3395_v14 }
0x195d   :  { %3397 = vmatprep.subr.bf16.mxu0 %v3614_v0 }
0x1960   :  { %3399 = vmatpush3.bf16.msra.mxu0 %v3398_v13 }
0x1961   :  { %3400 = vmatprep.subr.bf16.mxu0 %v3614_v0 }
0x1964   :  { %3402 = vmatpush3.bf16.msra.mxu0 %v3401_v9 }
0x1965   :  { %3403 = vmatprep.subr.bf16.mxu0 %v3614_v0 }
0x1968   :  { %3405 = vmatpush3.bf16.msra.mxu0 %v3404_v19 }
0x1969   :  { %3406 = vmatprep.subr.bf16.mxu0 %v3614_v0 }
0x196c   :  { %3408 = vmatpush3.bf16.msra.mxu0 %v3407_v31 }
0x1a22   :  { %v2423_v21 = vpop.f32.mrb[28].mxu0 }
0x1a23   :  { %v2424_v22 = vadd.f32 %v2423_v21, %v2353_v17  ;;  %v3092_v23 = vpop.f32.mrb[29].mxu0 }
0x1a25   :  { %v2446_v24 = vrot.slane %v2424_v22, 1 }
0x1a27   :  { %v2461_v26 = vsel %vm2460_vm10, %v4042_v16, %v2446_v24  ;;  %v2650_v16 = vld [vmem:[#allocation7 + $0x150] sm:$0xff] }
0x1a28   :  { %v2462_v27 = vmax.f32 %v2461_v26, 0.0  ;;  %v3416_v41 = vpack.c.bf16 %v2650_v16, %v2649_v29 }
0x1a2a   :  { %3126 = vmatmul.mubr.f32.vlgmr.msra.gmra.mrb[22].mxu1 %v2462_v27 }
0x1a2b   :  { %3195 = vmatprep.mubr.msk.f32.mxu1 %vm3615_vm0, %v3616_v1  ;;  %3411 = vmatpush3.bf16.msra.mxu1 %v3410_v36  ;;  %v2651_v1 = vld [vmem:[#allocation7 + $0x158] sm:$0xff] }
0x1a2c   :  { %3412 = vmatprep.subr.bf16.mxu1 %v3614_v0  ;;  %v3419_v30 = vpack.c.bf16 %v2652_v42, %v2651_v1 }
0x1a2f   :  { %3414 = vmatpush3.bf16.msra.mxu1 %v3413_v25 }
0x1a30   :  { %3415 = vmatprep.subr.bf16.mxu1 %v3614_v0 }
0x1a33   :  { %3417 = vmatpush3.bf16.msra.mxu1 %v3416_v41 }
0x1a34   :  { %3418 = vmatprep.subr.bf16.mxu1 %v3614_v0 }
0x1a37   :  { %3420 = vmatpush3.bf16.msra.mxu1 %v3419_v30 }
0x1a38   :  { %3421 = vmatprep.subr.bf16.mxu1 %v3614_v0 }
0x1a3b   :  { %3423 = vmatpush3.bf16.msra.mxu1 %v3422_v45 }
0x1a3c   :  { %3424 = vmatprep.subr.bf16.mxu1 %v3614_v0 }
0x1a3f   :  { %3426 = vmatpush3.bf16.msra.mxu1 %v3425_v12 }
0x1a40   :  { %3427 = vmatprep.subr.bf16.mxu1 %v3614_v0 }
0x1a43   :  { %3429 = vmatpush3.bf16.msra.mxu1 %v3428_v50 }
0x1a44   :  { %3430 = vmatprep.subr.bf16.mxu1 %v3614_v0 }
0x1a47   :  { %3432 = vmatpush3.bf16.msra.mxu1 %v3431_v58 }
0x1afd   :  { %v2549_v53 = vpop.f32.mrb[22].mxu1 }
0x1afe   :  { %v2550_v54 = vadd.f32 %v2549_v53, %v2482_v52  ;;  %v3127_v55 = vpop.f32.mrb[23].mxu1 }
0x1b00   :  { %v2553_v56 = vmax.f32 %v2550_v54, 0.0 }
0x1b02   :  { %3161 = vmatmul.mubr.f32.vlgmr.msra.gmra.mrb[30].mxu0 %v2553_v56 }
0x1bd5   :  { %v2640_v61 = vpop.f32.mrb[30].mxu0 }
0x1bd6   :  { %v2641_v62 = vadd.f32 %v2640_v61, %v2573_v60  ;;  %v3162_v63 = vpop.f32.mrb[31].mxu0 }
0x1bd8   :  { %v2644_v0 = vmax.f32 %v2641_v62, 0.0 }
0x1bda   :  { %3196 = vmatmul.mubr.f32.vlgmr.msra.gmra.mrb[24].mxu1 %v2644_v0 }
0x1cad   :  { %v2731_v6 = vpop.f32.mrb[24].mxu1 }
0x1cae   :  { %v2732_v10 = vadd.f32 %v2731_v6, %v2664_v3  ;;  %v3197_v4 = vpop.f32.mrb[25].mxu1 }
0x1cb0   :  { %2736 = vst.msk [vmem:[%s4087_s4] sm:$0xff] %vm2735_vm11, %v2732_v10 }
0x1cb1   :  { %2741 = vsyncpa [#allocation3], 1 }
0x1cb2   :  { %2742 = vsyncpa [#allocation5], 1 }
0x1cb3   :  { %2743 = vsyncpa [#allocation8], 1 }

</bundles_post_ra>
